<compile_context>
chip_gen: v6e
topology: v6e:2x2x1
jax: 0.10.0
libtpu: 0.0.40
codegen_flags: <defaults>
</compile_context>

<pallas_src>
import jax
import jax.numpy as jnp
from jax import lax
from jax.experimental import pallas as pl
from jax.experimental.pallas import tpu as pltpu

# ----------------------------- config (small) -----------------------------
B = 2            # batch
S = 8            # sequence length
H = 32           # hidden size
NUM_HEADS = 4
DH = H // NUM_HEADS
INTER = 64       # intermediate (FFN) size
NUM_LAYERS = 2
LN_EPS = 1e-12   # BertLayerNorm eps
T = B * S        # tokens (token-major layout inside the kernel)


def _layer_norm(x, gamma, beta, eps=LN_EPS):
    mu = jnp.mean(x, axis=-1, keepdims=True)
    var = jnp.mean((x - mu) ** 2, axis=-1, keepdims=True)
    return (x - mu) * lax.rsqrt(var + eps) * gamma + beta


# ------------------------------ Pallas kernel ------------------------------
def bert_encoder_kernel(h_ref, mask_ref, wqkv_ref, wo_ref, w1_ref, w2_ref,
                        vec_ref, out_ref):
    # Token-major resident hidden state: (T, H), fp32 throughout.
    h2 = h_ref[...].astype(jnp.float32)
    mask = mask_ref[...]                                   # (T, T) additive

    for l in range(NUM_LAYERS):                            # tiny stack: static unroll
        # -------- packed bias / LayerNorm vectors for this layer --------
        vec = vec_ref[l]                                   # (8, 128)
        bqkv  = vec[0:1, 0:3 * H]                          # (1, 3H)
        bo    = vec[1:2, 0:H]
        b1    = vec[2:3, 0:INTER]
        b2    = vec[3:4, 0:H]
        ln1_g = vec[4:5, 0:H]
        ln1_b = vec[5:6, 0:H]
        ln2_g = vec[6:7, 0:H]
        ln2_b = vec[7:8, 0:H]

        # ------------------- fused dense QKV projection -------------------
        # One (T,H)x(H,3H) matmul; 1/sqrt(DH) already folded into the Q block.
        qkv = jnp.dot(h2, wqkv_ref[l],
                      preferred_element_type=jnp.float32) + bqkv   # (T, 3H)

        # ---------------------- per-head attention ----------------------
        ctx_heads = []
        for n in range(NUM_HEADS):
            qh = qkv[:, 0 * H + n * DH: 0 * H + (n + 1) * DH]      # (T, DH)
            kh = qkv[:, 1 * H + n * DH: 1 * H + (n + 1) * DH]
            vh = qkv[:, 2 * H + n * DH: 2 * H + (n + 1) * DH]
            # scores: q . k^T via dot_general (contract last dims, no transpose)
            sc = lax.dot_general(qh, kh, (((1,), (1,)), ((), ())),
                                 preferred_element_type=jnp.float32)
            sc = sc + mask                                 # padding + cross-batch block mask
            m = jnp.max(sc, axis=-1, keepdims=True)
            e = jnp.exp(sc - m)
            pr = e / jnp.sum(e, axis=-1, keepdims=True)    # exact div (tolerance)
            ctx_heads.append(jnp.dot(pr, vh,
                                     preferred_element_type=jnp.float32))
        ctx = jnp.concatenate(ctx_heads, axis=-1)          # (T, H) head merge

        # single dense output projection against the original wo
        attn_out = jnp.dot(ctx, wo_ref[l],
                           preferred_element_type=jnp.float32) + bo
        # dropout is identity at inference
        h2 = _layer_norm(h2 + attn_out, ln1_g, ln1_b)

        # ------------------------------ FFN ------------------------------
        inter = jnp.dot(h2, w1_ref[l],
                        preferred_element_type=jnp.float32) + b1
        # TODO(synk): HF default "gelu" is the exact erf GELU; using the tanh
        # approximation ("gelu_new") since erf lowering is not guaranteed in
        # Mosaic. Matches the JAX reference below.
        inter = jax.nn.gelu(inter, approximate=True)
        ffn = jnp.dot(inter, w2_ref[l],
                      preferred_element_type=jnp.float32) + b2
        h2 = _layer_norm(h2 + ffn, ln2_g, ln2_b)

    out_ref[...] = h2.astype(out_ref.dtype)                # (T, H)


# ------------------------------ wrapper ------------------------------
def global_bert_encoder(hidden_states, additive_mask, params):
    """Runs NUM_LAYERS BERT layers; returns last_hidden_state (B, S, H)."""
    L = NUM_LAYERS

    # ---- host-side weight re-packing (done once, under jit/XLA) ----
    inv_sqrt_dh = jnp.float32(1.0) / jnp.sqrt(jnp.float32(DH))
    wq_s = params["wq"] * inv_sqrt_dh          # fold score scale into Q weight
    bq_s = params["bq"] * inv_sqrt_dh          # ... and Q bias
    wqkv = jnp.concatenate([wq_s, params["wk"], params["wv"]], axis=-1)  # (L,H,3H)
    bqkv = jnp.concatenate([bq_s, params["bk"], params["bv"]], axis=-1)  # (L,1,3H)

    # pack all tiny bias / LN vectors into one (L, 8, 128) operand
    def _pad_lanes(x, n=128):                  # (L, 1, d) -> (L, 1, n)
        return jnp.pad(x, ((0, 0), (0, 0), (0, n - x.shape[-1])))

    vecs = jnp.concatenate([
        _pad_lanes(bqkv),
        _pad_lanes(params["bo"]),
        _pad_lanes(params["b1"]),
        _pad_lanes(params["b2"]),
        _pad_lanes(params["ln1_g"]),
        _pad_lanes(params["ln1_b"]),
        _pad_lanes(params["ln2_g"]),
        _pad_lanes(params["ln2_b"]),
    ], axis=1)                                               # (L, 8, 128)

    # (T, T) extended additive mask: padding mask on keys, block-diagonal
    # across batch (cross-batch pairs get -1e9 so exp underflows to exactly 0,
    # making the token-major softmax identical to the per-batch softmax).
    batch_ids = jnp.repeat(jnp.arange(B), S)
    same_batch = batch_ids[:, None] == batch_ids[None, :]
    key_mask = additive_mask.reshape(T).astype(jnp.float32)
    mask2d = jnp.where(same_batch, key_mask[None, :], jnp.float32(-1e9))

    h2d = hidden_states.reshape(T, H).astype(jnp.float32)    # token-major input

    vmem = pl.BlockSpec(memory_space=pltpu.MemorySpace.VMEM)
    fn = pl.pallas_call(
        bert_encoder_kernel,
        out_shape=jax.ShapeDtypeStruct((T, H), jnp.float32),
        in_specs=[vmem] * 7,
        out_specs=vmem,
    )
    out2d = fn(h2d, mask2d, wqkv, params["wo"], params["w1"], params["w2"], vecs)
    return out2d.reshape(B, S, H)


# --------------------------- pure-JAX reference ---------------------------
def reference_encoder(hidden_states, additive_mask, params):
    h = hidden_states.astype(jnp.float32)
    for l in range(NUM_LAYERS):
        q = h @ params["wq"][l] + params["bq"][l]
        k = h @ params["wk"][l] + params["bk"][l]
        v = h @ params["wv"][l] + params["bv"][l]
        qh = q.reshape(B, S, NUM_HEADS, DH).transpose(0, 2, 1, 3)
        kh = k.reshape(B, S, NUM_HEADS, DH).transpose(0, 2, 1, 3)
        vh = v.reshape(B, S, NUM_HEADS, DH).transpose(0, 2, 1, 3)
        sc = jnp.einsum('bnqd,bnkd->bnqk', qh, kh) / jnp.sqrt(jnp.float32(DH))
        sc = sc + additive_mask[:, None, None, :]
        pr = jax.nn.softmax(sc, axis=-1)
        ctx = jnp.einsum('bnqk,bnkd->bnqd', pr, vh)
        ctx = ctx.transpose(0, 2, 1, 3).reshape(B, S, H)
        attn_out = ctx @ params["wo"][l] + params["bo"][l]
        h = _layer_norm(h + attn_out, params["ln1_g"][l], params["ln1_b"][l])
        inter = jax.nn.gelu(h @ params["w1"][l] + params["b1"][l],
                            approximate=True)
        ffn = inter @ params["w2"][l] + params["b2"][l]
        h = _layer_norm(h + ffn, params["ln2_g"][l], params["ln2_b"][l])
    return h


# ------------------------------ param init ------------------------------
def init_params(key):
    ks = jax.random.split(key, 8)
    std = 0.02
    p = {
        "wq": jax.random.normal(ks[0], (NUM_LAYERS, H, H), jnp.float32) * std,
        "wk": jax.random.normal(ks[1], (NUM_LAYERS, H, H), jnp.float32) * std,
        "wv": jax.random.normal(ks[2], (NUM_LAYERS, H, H), jnp.float32) * std,
        "wo": jax.random.normal(ks[3], (NUM_LAYERS, H, H), jnp.float32) * std,
        "w1": jax.random.normal(ks[4], (NUM_LAYERS, H, INTER), jnp.float32) * std,
        "w2": jax.random.normal(ks[5], (NUM_LAYERS, INTER, H), jnp.float32) * std,
        "bq": jnp.zeros((NUM_LAYERS, 1, H), jnp.float32),
        "bk": jnp.zeros((NUM_LAYERS, 1, H), jnp.float32),
        "bv": jnp.zeros((NUM_LAYERS, 1, H), jnp.float32),
        "bo": jnp.zeros((NUM_LAYERS, 1, H), jnp.float32),
        "b1": jnp.zeros((NUM_LAYERS, 1, INTER), jnp.float32),
        "b2": jnp.zeros((NUM_LAYERS, 1, H), jnp.float32),
        "ln1_g": jnp.ones((NUM_LAYERS, 1, H), jnp.float32),
        "ln1_b": jnp.zeros((NUM_LAYERS, 1, H), jnp.float32),
        "ln2_g": jnp.ones((NUM_LAYERS, 1, H), jnp.float32),
        "ln2_b": jnp.zeros((NUM_LAYERS, 1, H), jnp.float32),
    }
    return p


if __name__ == "__main__":
    key = jax.random.PRNGKey(0)
    k_h, k_p = jax.random.split(key)

    hidden_states = jax.random.normal(k_h, (B, S, H), jnp.float32)
    params = init_params(k_p)

    # padding mask: last 2 tokens of batch element 1 are padding
    pad_mask = jnp.ones((B, S), jnp.float32).at[1, -2:].set(0.0)
    additive_mask = (1.0 - pad_mask) * -10000.0   # HF extended attention mask

    out = global_bert_encoder(hidden_states, additive_mask, params)
    out = jax.block_until_ready(out)

    ref = reference_encoder(hidden_states, additive_mask, params)
    assert out.shape == (B, S, H)
    assert jnp.allclose(out, ref, rtol=1e-4, atol=1e-4), (
        f"max abs err {jnp.max(jnp.abs(out - ref))}")

    print("KERNEL_OK")
</pallas_src>

<mosaic_0001>
module attributes {stable_mosaic.version = 11 : i64} {
  func.func @bert_encoder_kernel(%arg0: memref<16x32xf32, #tpu.memory_space<vmem>>, %arg1: memref<16x16xf32, #tpu.memory_space<vmem>>, %arg2: memref<2x32x96xf32, #tpu.memory_space<vmem>>, %arg3: memref<2x32x32xf32, #tpu.memory_space<vmem>>, %arg4: memref<2x32x64xf32, #tpu.memory_space<vmem>>, %arg5: memref<2x64x32xf32, #tpu.memory_space<vmem>>, %arg6: memref<2x8x128xf32, #tpu.memory_space<vmem>>, %arg7: memref<16x32xf32, #tpu.memory_space<vmem>>) attributes {dimension_semantics = [], scalar_prefetch = 0 : i64, scratch_operands = 0 : i64, tpu.core_type = #tpu.core_type<tc>} {
    %c0 = arith.constant 0 : index
    %c0_0 = arith.constant 0 : index
    %0 = vector.load %arg0[%c0, %c0_0] : memref<16x32xf32, #tpu.memory_space<vmem>>, vector<16x32xf32>
    %c0_1 = arith.constant 0 : index
    %c0_2 = arith.constant 0 : index
    %1 = vector.load %arg1[%c0_1, %c0_2] : memref<16x16xf32, #tpu.memory_space<vmem>>, vector<16x16xf32>
    %c0_3 = arith.constant 0 : index
    %c0_4 = arith.constant 0 : index
    %c0_5 = arith.constant 0 : index
    %2 = vector.load %arg6[%c0_3, %c0_4, %c0_5] : memref<2x8x128xf32, #tpu.memory_space<vmem>>, vector<1x8x128xf32>
    %3 = vector.shape_cast %2 : vector<1x8x128xf32> to vector<8x128xf32>
    %4 = vector.extract_strided_slice %3 {offsets = [0, 0], sizes = [1, 96], strides = [1, 1]} : vector<8x128xf32> to vector<1x96xf32>
    %5 = vector.extract_strided_slice %3 {offsets = [1, 0], sizes = [1, 32], strides = [1, 1]} : vector<8x128xf32> to vector<1x32xf32>
    %6 = vector.extract_strided_slice %3 {offsets = [2, 0], sizes = [1, 64], strides = [1, 1]} : vector<8x128xf32> to vector<1x64xf32>
    %7 = vector.extract_strided_slice %3 {offsets = [3, 0], sizes = [1, 32], strides = [1, 1]} : vector<8x128xf32> to vector<1x32xf32>
    %8 = vector.extract_strided_slice %3 {offsets = [4, 0], sizes = [1, 32], strides = [1, 1]} : vector<8x128xf32> to vector<1x32xf32>
    %9 = vector.extract_strided_slice %3 {offsets = [5, 0], sizes = [1, 32], strides = [1, 1]} : vector<8x128xf32> to vector<1x32xf32>
    %10 = vector.extract_strided_slice %3 {offsets = [6, 0], sizes = [1, 32], strides = [1, 1]} : vector<8x128xf32> to vector<1x32xf32>
    %11 = vector.extract_strided_slice %3 {offsets = [7, 0], sizes = [1, 32], strides = [1, 1]} : vector<8x128xf32> to vector<1x32xf32>
    %c0_6 = arith.constant 0 : index
    %c0_7 = arith.constant 0 : index
    %c0_8 = arith.constant 0 : index
    %12 = vector.load %arg2[%c0_6, %c0_7, %c0_8] : memref<2x32x96xf32, #tpu.memory_space<vmem>>, vector<1x32x96xf32>
    %13 = vector.shape_cast %12 : vector<1x32x96xf32> to vector<32x96xf32>
    %cst = arith.constant dense<0.000000e+00> : vector<16x96xf32>
    %14 = tpu.matmul %0, %13, %cst {dimension_numbers = #tpu.dot_dimension_numbers<[1], [0], [0], [1], [0, 0, 1, 1], [], []>} : vector<16x32xf32>, vector<32x96xf32>, vector<16x96xf32> -> vector<16x96xf32>
    %15 = vector.broadcast %4 : vector<1x96xf32> to vector<16x96xf32>
    %16 = arith.addf %14, %15 : vector<16x96xf32>
    %17 = vector.extract_strided_slice %16 {offsets = [0, 0], sizes = [16, 8], strides = [1, 1]} : vector<16x96xf32> to vector<16x8xf32>
    %18 = vector.extract_strided_slice %16 {offsets = [0, 32], sizes = [16, 8], strides = [1, 1]} : vector<16x96xf32> to vector<16x8xf32>
    %19 = vector.extract_strided_slice %16 {offsets = [0, 64], sizes = [16, 8], strides = [1, 1]} : vector<16x96xf32> to vector<16x8xf32>
    %cst_9 = arith.constant dense<0.000000e+00> : vector<16x16xf32>
    %20 = tpu.matmul %17, %18, %cst_9 {dimension_numbers = #tpu.dot_dimension_numbers<[1], [1], [0], [0], [0, 0, 1, 0], [], []>} : vector<16x8xf32>, vector<16x8xf32>, vector<16x16xf32> -> vector<16x16xf32>
    %21 = arith.addf %20, %1 : vector<16x16xf32>
    %cst_10 = arith.constant dense<0xFF800000> : vector<16xf32>
    %22 = vector.multi_reduction <maximumf>, %21, %cst_10 [1] : vector<16x16xf32> to vector<16xf32>
    %23 = vector.shape_cast %22 : vector<16xf32> to vector<16x1xf32>
    %24 = vector.broadcast %23 : vector<16x1xf32> to vector<16x16xf32>
    %25 = arith.subf %21, %24 : vector<16x16xf32>
    %26 = math.exp %25 : vector<16x16xf32>
    %cst_11 = arith.constant dense<0.000000e+00> : vector<16xf32>
    %27 = vector.multi_reduction <add>, %26, %cst_11 [1] : vector<16x16xf32> to vector<16xf32>
    %28 = vector.shape_cast %27 : vector<16xf32> to vector<16x1xf32>
    %29 = vector.broadcast %28 : vector<16x1xf32> to vector<16x16xf32>
    %30 = arith.divf %26, %29 : vector<16x16xf32>
    %cst_12 = arith.constant dense<0.000000e+00> : vector<16x8xf32>
    %31 = tpu.matmul %30, %19, %cst_12 {dimension_numbers = #tpu.dot_dimension_numbers<[1], [0], [0], [1], [0, 0, 1, 1], [], []>} : vector<16x16xf32>, vector<16x8xf32>, vector<16x8xf32> -> vector<16x8xf32>
    %32 = vector.extract_strided_slice %16 {offsets = [0, 8], sizes = [16, 8], strides = [1, 1]} : vector<16x96xf32> to vector<16x8xf32>
    %33 = vector.extract_strided_slice %16 {offsets = [0, 40], sizes = [16, 8], strides = [1, 1]} : vector<16x96xf32> to vector<16x8xf32>
    %34 = vector.extract_strided_slice %16 {offsets = [0, 72], sizes = [16, 8], strides = [1, 1]} : vector<16x96xf32> to vector<16x8xf32>
    %cst_13 = arith.constant dense<0.000000e+00> : vector<16x16xf32>
    %35 = tpu.matmul %32, %33, %cst_13 {dimension_numbers = #tpu.dot_dimension_numbers<[1], [1], [0], [0], [0, 0, 1, 0], [], []>} : vector<16x8xf32>, vector<16x8xf32>, vector<16x16xf32> -> vector<16x16xf32>
    %36 = arith.addf %35, %1 : vector<16x16xf32>
    %cst_14 = arith.constant dense<0xFF800000> : vector<16xf32>
    %37 = vector.multi_reduction <maximumf>, %36, %cst_14 [1] : vector<16x16xf32> to vector<16xf32>
    %38 = vector.shape_cast %37 : vector<16xf32> to vector<16x1xf32>
    %39 = vector.broadcast %38 : vector<16x1xf32> to vector<16x16xf32>
    %40 = arith.subf %36, %39 : vector<16x16xf32>
    %41 = math.exp %40 : vector<16x16xf32>
    %cst_15 = arith.constant dense<0.000000e+00> : vector<16xf32>
    %42 = vector.multi_reduction <add>, %41, %cst_15 [1] : vector<16x16xf32> to vector<16xf32>
    %43 = vector.shape_cast %42 : vector<16xf32> to vector<16x1xf32>
    %44 = vector.broadcast %43 : vector<16x1xf32> to vector<16x16xf32>
    %45 = arith.divf %41, %44 : vector<16x16xf32>
    %cst_16 = arith.constant dense<0.000000e+00> : vector<16x8xf32>
    %46 = tpu.matmul %45, %34, %cst_16 {dimension_numbers = #tpu.dot_dimension_numbers<[1], [0], [0], [1], [0, 0, 1, 1], [], []>} : vector<16x16xf32>, vector<16x8xf32>, vector<16x8xf32> -> vector<16x8xf32>
    %47 = vector.extract_strided_slice %16 {offsets = [0, 16], sizes = [16, 8], strides = [1, 1]} : vector<16x96xf32> to vector<16x8xf32>
    %48 = vector.extract_strided_slice %16 {offsets = [0, 48], sizes = [16, 8], strides = [1, 1]} : vector<16x96xf32> to vector<16x8xf32>
    %49 = vector.extract_strided_slice %16 {offsets = [0, 80], sizes = [16, 8], strides = [1, 1]} : vector<16x96xf32> to vector<16x8xf32>
    %cst_17 = arith.constant dense<0.000000e+00> : vector<16x16xf32>
    %50 = tpu.matmul %47, %48, %cst_17 {dimension_numbers = #tpu.dot_dimension_numbers<[1], [1], [0], [0], [0, 0, 1, 0], [], []>} : vector<16x8xf32>, vector<16x8xf32>, vector<16x16xf32> -> vector<16x16xf32>
    %51 = arith.addf %50, %1 : vector<16x16xf32>
    %cst_18 = arith.constant dense<0xFF800000> : vector<16xf32>
    %52 = vector.multi_reduction <maximumf>, %51, %cst_18 [1] : vector<16x16xf32> to vector<16xf32>
    %53 = vector.shape_cast %52 : vector<16xf32> to vector<16x1xf32>
    %54 = vector.broadcast %53 : vector<16x1xf32> to vector<16x16xf32>
    %55 = arith.subf %51, %54 : vector<16x16xf32>
    %56 = math.exp %55 : vector<16x16xf32>
    %cst_19 = arith.constant dense<0.000000e+00> : vector<16xf32>
    %57 = vector.multi_reduction <add>, %56, %cst_19 [1] : vector<16x16xf32> to vector<16xf32>
    %58 = vector.shape_cast %57 : vector<16xf32> to vector<16x1xf32>
    %59 = vector.broadcast %58 : vector<16x1xf32> to vector<16x16xf32>
    %60 = arith.divf %56, %59 : vector<16x16xf32>
    %cst_20 = arith.constant dense<0.000000e+00> : vector<16x8xf32>
    %61 = tpu.matmul %60, %49, %cst_20 {dimension_numbers = #tpu.dot_dimension_numbers<[1], [0], [0], [1], [0, 0, 1, 1], [], []>} : vector<16x16xf32>, vector<16x8xf32>, vector<16x8xf32> -> vector<16x8xf32>
    %62 = vector.extract_strided_slice %16 {offsets = [0, 24], sizes = [16, 8], strides = [1, 1]} : vector<16x96xf32> to vector<16x8xf32>
    %63 = vector.extract_strided_slice %16 {offsets = [0, 56], sizes = [16, 8], strides = [1, 1]} : vector<16x96xf32> to vector<16x8xf32>
    %64 = vector.extract_strided_slice %16 {offsets = [0, 88], sizes = [16, 8], strides = [1, 1]} : vector<16x96xf32> to vector<16x8xf32>
    %cst_21 = arith.constant dense<0.000000e+00> : vector<16x16xf32>
    %65 = tpu.matmul %62, %63, %cst_21 {dimension_numbers = #tpu.dot_dimension_numbers<[1], [1], [0], [0], [0, 0, 1, 0], [], []>} : vector<16x8xf32>, vector<16x8xf32>, vector<16x16xf32> -> vector<16x16xf32>
    %66 = arith.addf %65, %1 : vector<16x16xf32>
    %cst_22 = arith.constant dense<0xFF800000> : vector<16xf32>
    %67 = vector.multi_reduction <maximumf>, %66, %cst_22 [1] : vector<16x16xf32> to vector<16xf32>
    %68 = vector.shape_cast %67 : vector<16xf32> to vector<16x1xf32>
    %69 = vector.broadcast %68 : vector<16x1xf32> to vector<16x16xf32>
    %70 = arith.subf %66, %69 : vector<16x16xf32>
    %71 = math.exp %70 : vector<16x16xf32>
    %cst_23 = arith.constant dense<0.000000e+00> : vector<16xf32>
    %72 = vector.multi_reduction <add>, %71, %cst_23 [1] : vector<16x16xf32> to vector<16xf32>
    %73 = vector.shape_cast %72 : vector<16xf32> to vector<16x1xf32>
    %74 = vector.broadcast %73 : vector<16x1xf32> to vector<16x16xf32>
    %75 = arith.divf %71, %74 : vector<16x16xf32>
    %cst_24 = arith.constant dense<0.000000e+00> : vector<16x8xf32>
    %76 = tpu.matmul %75, %64, %cst_24 {dimension_numbers = #tpu.dot_dimension_numbers<[1], [0], [0], [1], [0, 0, 1, 1], [], []>} : vector<16x16xf32>, vector<16x8xf32>, vector<16x8xf32> -> vector<16x8xf32>
    %77 = tpu.concatenate %31, %46, %61, %76 in 1 : vector<16x8xf32>, vector<16x8xf32>, vector<16x8xf32>, vector<16x8xf32> -> vector<16x32xf32>
    %c0_25 = arith.constant 0 : index
    %c0_26 = arith.constant 0 : index
    %c0_27 = arith.constant 0 : index
    %78 = vector.load %arg3[%c0_25, %c0_26, %c0_27] : memref<2x32x32xf32, #tpu.memory_space<vmem>>, vector<1x32x32xf32>
    %79 = vector.shape_cast %78 : vector<1x32x32xf32> to vector<32x32xf32>
    %cst_28 = arith.constant dense<0.000000e+00> : vector<16x32xf32>
    %80 = tpu.matmul %77, %79, %cst_28 {dimension_numbers = #tpu.dot_dimension_numbers<[1], [0], [0], [1], [0, 0, 1, 1], [], []>} : vector<16x32xf32>, vector<32x32xf32>, vector<16x32xf32> -> vector<16x32xf32>
    %81 = vector.broadcast %5 : vector<1x32xf32> to vector<16x32xf32>
    %82 = arith.addf %80, %81 : vector<16x32xf32>
    %83 = arith.addf %0, %82 : vector<16x32xf32>
    %cst_29 = arith.constant dense<0.000000e+00> : vector<16xf32>
    %84 = vector.multi_reduction <add>, %83, %cst_29 [1] : vector<16x32xf32> to vector<16xf32>
    %85 = vector.shape_cast %84 : vector<16xf32> to vector<16x1xf32>
    %cst_30 = arith.constant 3.200000e+01 : f32
    %86 = vector.broadcast %cst_30 : f32 to vector<16x1xf32>
    %87 = arith.divf %85, %86 : vector<16x1xf32>
    %88 = vector.broadcast %87 : vector<16x1xf32> to vector<16x32xf32>
    %89 = arith.subf %83, %88 : vector<16x32xf32>
    %90 = arith.mulf %89, %89 : vector<16x32xf32>
    %cst_31 = arith.constant dense<0.000000e+00> : vector<16xf32>
    %91 = vector.multi_reduction <add>, %90, %cst_31 [1] : vector<16x32xf32> to vector<16xf32>
    %92 = vector.shape_cast %91 : vector<16xf32> to vector<16x1xf32>
    %cst_32 = arith.constant 3.200000e+01 : f32
    %93 = vector.broadcast %cst_32 : f32 to vector<16x1xf32>
    %94 = arith.divf %92, %93 : vector<16x1xf32>
    %95 = vector.broadcast %87 : vector<16x1xf32> to vector<16x32xf32>
    %96 = arith.subf %83, %95 : vector<16x32xf32>
    %cst_33 = arith.constant 9.99999996E-13 : f32
    %97 = vector.broadcast %cst_33 : f32 to vector<16x1xf32>
    %98 = arith.addf %94, %97 : vector<16x1xf32>
    %99 = math.rsqrt %98 : vector<16x1xf32>
    %100 = vector.broadcast %99 : vector<16x1xf32> to vector<16x32xf32>
    %101 = arith.mulf %96, %100 : vector<16x32xf32>
    %102 = vector.broadcast %8 : vector<1x32xf32> to vector<16x32xf32>
    %103 = arith.mulf %101, %102 : vector<16x32xf32>
    %104 = vector.broadcast %9 : vector<1x32xf32> to vector<16x32xf32>
    %105 = arith.addf %103, %104 : vector<16x32xf32>
    %c0_34 = arith.constant 0 : index
    %c0_35 = arith.constant 0 : index
    %c0_36 = arith.constant 0 : index
    %106 = vector.load %arg4[%c0_34, %c0_35, %c0_36] : memref<2x32x64xf32, #tpu.memory_space<vmem>>, vector<1x32x64xf32>
    %107 = vector.shape_cast %106 : vector<1x32x64xf32> to vector<32x64xf32>
    %cst_37 = arith.constant dense<0.000000e+00> : vector<16x64xf32>
    %108 = tpu.matmul %105, %107, %cst_37 {dimension_numbers = #tpu.dot_dimension_numbers<[1], [0], [0], [1], [0, 0, 1, 1], [], []>} : vector<16x32xf32>, vector<32x64xf32>, vector<16x64xf32> -> vector<16x64xf32>
    %109 = vector.broadcast %6 : vector<1x64xf32> to vector<16x64xf32>
    %110 = arith.addf %108, %109 : vector<16x64xf32>
    %111 = arith.mulf %110, %110 : vector<16x64xf32>
    %112 = arith.mulf %110, %111 : vector<16x64xf32>
    %cst_38 = arith.constant 4.471500e-02 : f32
    %113 = vector.broadcast %cst_38 : f32 to vector<16x64xf32>
    %114 = arith.mulf %113, %112 : vector<16x64xf32>
    %115 = arith.addf %110, %114 : vector<16x64xf32>
    %cst_39 = arith.constant 0.797884583 : f32
    %116 = vector.broadcast %cst_39 : f32 to vector<16x64xf32>
    %117 = arith.mulf %116, %115 : vector<16x64xf32>
    %118 = math.tanh %117 : vector<16x64xf32>
    %cst_40 = arith.constant 1.000000e+00 : f32
    %119 = vector.broadcast %cst_40 : f32 to vector<16x64xf32>
    %120 = arith.addf %119, %118 : vector<16x64xf32>
    %cst_41 = arith.constant 5.000000e-01 : f32
    %121 = vector.broadcast %cst_41 : f32 to vector<16x64xf32>
    %122 = arith.mulf %121, %120 : vector<16x64xf32>
    %123 = arith.mulf %110, %122 : vector<16x64xf32>
    %c0_42 = arith.constant 0 : index
    %c0_43 = arith.constant 0 : index
    %c0_44 = arith.constant 0 : index
    %124 = vector.load %arg5[%c0_42, %c0_43, %c0_44] : memref<2x64x32xf32, #tpu.memory_space<vmem>>, vector<1x64x32xf32>
    %125 = vector.shape_cast %124 : vector<1x64x32xf32> to vector<64x32xf32>
    %cst_45 = arith.constant dense<0.000000e+00> : vector<16x32xf32>
    %126 = tpu.matmul %123, %125, %cst_45 {dimension_numbers = #tpu.dot_dimension_numbers<[1], [0], [0], [1], [0, 0, 1, 1], [], []>} : vector<16x64xf32>, vector<64x32xf32>, vector<16x32xf32> -> vector<16x32xf32>
    %127 = vector.broadcast %7 : vector<1x32xf32> to vector<16x32xf32>
    %128 = arith.addf %126, %127 : vector<16x32xf32>
    %129 = arith.addf %105, %128 : vector<16x32xf32>
    %cst_46 = arith.constant dense<0.000000e+00> : vector<16xf32>
    %130 = vector.multi_reduction <add>, %129, %cst_46 [1] : vector<16x32xf32> to vector<16xf32>
    %131 = vector.shape_cast %130 : vector<16xf32> to vector<16x1xf32>
    %cst_47 = arith.constant 3.200000e+01 : f32
    %132 = vector.broadcast %cst_47 : f32 to vector<16x1xf32>
    %133 = arith.divf %131, %132 : vector<16x1xf32>
    %134 = vector.broadcast %133 : vector<16x1xf32> to vector<16x32xf32>
    %135 = arith.subf %129, %134 : vector<16x32xf32>
    %136 = arith.mulf %135, %135 : vector<16x32xf32>
    %cst_48 = arith.constant dense<0.000000e+00> : vector<16xf32>
    %137 = vector.multi_reduction <add>, %136, %cst_48 [1] : vector<16x32xf32> to vector<16xf32>
    %138 = vector.shape_cast %137 : vector<16xf32> to vector<16x1xf32>
    %cst_49 = arith.constant 3.200000e+01 : f32
    %139 = vector.broadcast %cst_49 : f32 to vector<16x1xf32>
    %140 = arith.divf %138, %139 : vector<16x1xf32>
    %141 = vector.broadcast %133 : vector<16x1xf32> to vector<16x32xf32>
    %142 = arith.subf %129, %141 : vector<16x32xf32>
    %cst_50 = arith.constant 9.99999996E-13 : f32
    %143 = vector.broadcast %cst_50 : f32 to vector<16x1xf32>
    %144 = arith.addf %140, %143 : vector<16x1xf32>
    %145 = math.rsqrt %144 : vector<16x1xf32>
    %146 = vector.broadcast %145 : vector<16x1xf32> to vector<16x32xf32>
    %147 = arith.mulf %142, %146 : vector<16x32xf32>
    %148 = vector.broadcast %10 : vector<1x32xf32> to vector<16x32xf32>
    %149 = arith.mulf %147, %148 : vector<16x32xf32>
    %150 = vector.broadcast %11 : vector<1x32xf32> to vector<16x32xf32>
    %151 = arith.addf %149, %150 : vector<16x32xf32>
    %c1 = arith.constant 1 : index
    %c0_51 = arith.constant 0 : index
    %c0_52 = arith.constant 0 : index
    %152 = vector.load %arg6[%c1, %c0_51, %c0_52] : memref<2x8x128xf32, #tpu.memory_space<vmem>>, vector<1x8x128xf32>
    %153 = vector.shape_cast %152 : vector<1x8x128xf32> to vector<8x128xf32>
    %154 = vector.extract_strided_slice %153 {offsets = [0, 0], sizes = [1, 96], strides = [1, 1]} : vector<8x128xf32> to vector<1x96xf32>
    %155 = vector.extract_strided_slice %153 {offsets = [1, 0], sizes = [1, 32], strides = [1, 1]} : vector<8x128xf32> to vector<1x32xf32>
    %156 = vector.extract_strided_slice %153 {offsets = [2, 0], sizes = [1, 64], strides = [1, 1]} : vector<8x128xf32> to vector<1x64xf32>
    %157 = vector.extract_strided_slice %153 {offsets = [3, 0], sizes = [1, 32], strides = [1, 1]} : vector<8x128xf32> to vector<1x32xf32>
    %158 = vector.extract_strided_slice %153 {offsets = [4, 0], sizes = [1, 32], strides = [1, 1]} : vector<8x128xf32> to vector<1x32xf32>
    %159 = vector.extract_strided_slice %153 {offsets = [5, 0], sizes = [1, 32], strides = [1, 1]} : vector<8x128xf32> to vector<1x32xf32>
    %160 = vector.extract_strided_slice %153 {offsets = [6, 0], sizes = [1, 32], strides = [1, 1]} : vector<8x128xf32> to vector<1x32xf32>
    %161 = vector.extract_strided_slice %153 {offsets = [7, 0], sizes = [1, 32], strides = [1, 1]} : vector<8x128xf32> to vector<1x32xf32>
    %c1_53 = arith.constant 1 : index
    %c0_54 = arith.constant 0 : index
    %c0_55 = arith.constant 0 : index
    %162 = vector.load %arg2[%c1_53, %c0_54, %c0_55] : memref<2x32x96xf32, #tpu.memory_space<vmem>>, vector<1x32x96xf32>
    %163 = vector.shape_cast %162 : vector<1x32x96xf32> to vector<32x96xf32>
    %cst_56 = arith.constant dense<0.000000e+00> : vector<16x96xf32>
    %164 = tpu.matmul %151, %163, %cst_56 {dimension_numbers = #tpu.dot_dimension_numbers<[1], [0], [0], [1], [0, 0, 1, 1], [], []>} : vector<16x32xf32>, vector<32x96xf32>, vector<16x96xf32> -> vector<16x96xf32>
    %165 = vector.broadcast %154 : vector<1x96xf32> to vector<16x96xf32>
    %166 = arith.addf %164, %165 : vector<16x96xf32>
    %167 = vector.extract_strided_slice %166 {offsets = [0, 0], sizes = [16, 8], strides = [1, 1]} : vector<16x96xf32> to vector<16x8xf32>
    %168 = vector.extract_strided_slice %166 {offsets = [0, 32], sizes = [16, 8], strides = [1, 1]} : vector<16x96xf32> to vector<16x8xf32>
    %169 = vector.extract_strided_slice %166 {offsets = [0, 64], sizes = [16, 8], strides = [1, 1]} : vector<16x96xf32> to vector<16x8xf32>
    %cst_57 = arith.constant dense<0.000000e+00> : vector<16x16xf32>
    %170 = tpu.matmul %167, %168, %cst_57 {dimension_numbers = #tpu.dot_dimension_numbers<[1], [1], [0], [0], [0, 0, 1, 0], [], []>} : vector<16x8xf32>, vector<16x8xf32>, vector<16x16xf32> -> vector<16x16xf32>
    %171 = arith.addf %170, %1 : vector<16x16xf32>
    %cst_58 = arith.constant dense<0xFF800000> : vector<16xf32>
    %172 = vector.multi_reduction <maximumf>, %171, %cst_58 [1] : vector<16x16xf32> to vector<16xf32>
    %173 = vector.shape_cast %172 : vector<16xf32> to vector<16x1xf32>
    %174 = vector.broadcast %173 : vector<16x1xf32> to vector<16x16xf32>
    %175 = arith.subf %171, %174 : vector<16x16xf32>
    %176 = math.exp %175 : vector<16x16xf32>
    %cst_59 = arith.constant dense<0.000000e+00> : vector<16xf32>
    %177 = vector.multi_reduction <add>, %176, %cst_59 [1] : vector<16x16xf32> to vector<16xf32>
    %178 = vector.shape_cast %177 : vector<16xf32> to vector<16x1xf32>
    %179 = vector.broadcast %178 : vector<16x1xf32> to vector<16x16xf32>
    %180 = arith.divf %176, %179 : vector<16x16xf32>
    %cst_60 = arith.constant dense<0.000000e+00> : vector<16x8xf32>
    %181 = tpu.matmul %180, %169, %cst_60 {dimension_numbers = #tpu.dot_dimension_numbers<[1], [0], [0], [1], [0, 0, 1, 1], [], []>} : vector<16x16xf32>, vector<16x8xf32>, vector<16x8xf32> -> vector<16x8xf32>
    %182 = vector.extract_strided_slice %166 {offsets = [0, 8], sizes = [16, 8], strides = [1, 1]} : vector<16x96xf32> to vector<16x8xf32>
    %183 = vector.extract_strided_slice %166 {offsets = [0, 40], sizes = [16, 8], strides = [1, 1]} : vector<16x96xf32> to vector<16x8xf32>
    %184 = vector.extract_strided_slice %166 {offsets = [0, 72], sizes = [16, 8], strides = [1, 1]} : vector<16x96xf32> to vector<16x8xf32>
    %cst_61 = arith.constant dense<0.000000e+00> : vector<16x16xf32>
    %185 = tpu.matmul %182, %183, %cst_61 {dimension_numbers = #tpu.dot_dimension_numbers<[1], [1], [0], [0], [0, 0, 1, 0], [], []>} : vector<16x8xf32>, vector<16x8xf32>, vector<16x16xf32> -> vector<16x16xf32>
    %186 = arith.addf %185, %1 : vector<16x16xf32>
    %cst_62 = arith.constant dense<0xFF800000> : vector<16xf32>
    %187 = vector.multi_reduction <maximumf>, %186, %cst_62 [1] : vector<16x16xf32> to vector<16xf32>
    %188 = vector.shape_cast %187 : vector<16xf32> to vector<16x1xf32>
    %189 = vector.broadcast %188 : vector<16x1xf32> to vector<16x16xf32>
    %190 = arith.subf %186, %189 : vector<16x16xf32>
    %191 = math.exp %190 : vector<16x16xf32>
    %cst_63 = arith.constant dense<0.000000e+00> : vector<16xf32>
    %192 = vector.multi_reduction <add>, %191, %cst_63 [1] : vector<16x16xf32> to vector<16xf32>
    %193 = vector.shape_cast %192 : vector<16xf32> to vector<16x1xf32>
    %194 = vector.broadcast %193 : vector<16x1xf32> to vector<16x16xf32>
    %195 = arith.divf %191, %194 : vector<16x16xf32>
    %cst_64 = arith.constant dense<0.000000e+00> : vector<16x8xf32>
    %196 = tpu.matmul %195, %184, %cst_64 {dimension_numbers = #tpu.dot_dimension_numbers<[1], [0], [0], [1], [0, 0, 1, 1], [], []>} : vector<16x16xf32>, vector<16x8xf32>, vector<16x8xf32> -> vector<16x8xf32>
    %197 = vector.extract_strided_slice %166 {offsets = [0, 16], sizes = [16, 8], strides = [1, 1]} : vector<16x96xf32> to vector<16x8xf32>
    %198 = vector.extract_strided_slice %166 {offsets = [0, 48], sizes = [16, 8], strides = [1, 1]} : vector<16x96xf32> to vector<16x8xf32>
    %199 = vector.extract_strided_slice %166 {offsets = [0, 80], sizes = [16, 8], strides = [1, 1]} : vector<16x96xf32> to vector<16x8xf32>
    %cst_65 = arith.constant dense<0.000000e+00> : vector<16x16xf32>
    %200 = tpu.matmul %197, %198, %cst_65 {dimension_numbers = #tpu.dot_dimension_numbers<[1], [1], [0], [0], [0, 0, 1, 0], [], []>} : vector<16x8xf32>, vector<16x8xf32>, vector<16x16xf32> -> vector<16x16xf32>
    %201 = arith.addf %200, %1 : vector<16x16xf32>
    %cst_66 = arith.constant dense<0xFF800000> : vector<16xf32>
    %202 = vector.multi_reduction <maximumf>, %201, %cst_66 [1] : vector<16x16xf32> to vector<16xf32>
    %203 = vector.shape_cast %202 : vector<16xf32> to vector<16x1xf32>
    %204 = vector.broadcast %203 : vector<16x1xf32> to vector<16x16xf32>
    %205 = arith.subf %201, %204 : vector<16x16xf32>
    %206 = math.exp %205 : vector<16x16xf32>
    %cst_67 = arith.constant dense<0.000000e+00> : vector<16xf32>
    %207 = vector.multi_reduction <add>, %206, %cst_67 [1] : vector<16x16xf32> to vector<16xf32>
    %208 = vector.shape_cast %207 : vector<16xf32> to vector<16x1xf32>
    %209 = vector.broadcast %208 : vector<16x1xf32> to vector<16x16xf32>
    %210 = arith.divf %206, %209 : vector<16x16xf32>
    %cst_68 = arith.constant dense<0.000000e+00> : vector<16x8xf32>
    %211 = tpu.matmul %210, %199, %cst_68 {dimension_numbers = #tpu.dot_dimension_numbers<[1], [0], [0], [1], [0, 0, 1, 1], [], []>} : vector<16x16xf32>, vector<16x8xf32>, vector<16x8xf32> -> vector<16x8xf32>
    %212 = vector.extract_strided_slice %166 {offsets = [0, 24], sizes = [16, 8], strides = [1, 1]} : vector<16x96xf32> to vector<16x8xf32>
    %213 = vector.extract_strided_slice %166 {offsets = [0, 56], sizes = [16, 8], strides = [1, 1]} : vector<16x96xf32> to vector<16x8xf32>
    %214 = vector.extract_strided_slice %166 {offsets = [0, 88], sizes = [16, 8], strides = [1, 1]} : vector<16x96xf32> to vector<16x8xf32>
    %cst_69 = arith.constant dense<0.000000e+00> : vector<16x16xf32>
    %215 = tpu.matmul %212, %213, %cst_69 {dimension_numbers = #tpu.dot_dimension_numbers<[1], [1], [0], [0], [0, 0, 1, 0], [], []>} : vector<16x8xf32>, vector<16x8xf32>, vector<16x16xf32> -> vector<16x16xf32>
    %216 = arith.addf %215, %1 : vector<16x16xf32>
    %cst_70 = arith.constant dense<0xFF800000> : vector<16xf32>
    %217 = vector.multi_reduction <maximumf>, %216, %cst_70 [1] : vector<16x16xf32> to vector<16xf32>
    %218 = vector.shape_cast %217 : vector<16xf32> to vector<16x1xf32>
    %219 = vector.broadcast %218 : vector<16x1xf32> to vector<16x16xf32>
    %220 = arith.subf %216, %219 : vector<16x16xf32>
    %221 = math.exp %220 : vector<16x16xf32>
    %cst_71 = arith.constant dense<0.000000e+00> : vector<16xf32>
    %222 = vector.multi_reduction <add>, %221, %cst_71 [1] : vector<16x16xf32> to vector<16xf32>
    %223 = vector.shape_cast %222 : vector<16xf32> to vector<16x1xf32>
    %224 = vector.broadcast %223 : vector<16x1xf32> to vector<16x16xf32>
    %225 = arith.divf %221, %224 : vector<16x16xf32>
    %cst_72 = arith.constant dense<0.000000e+00> : vector<16x8xf32>
    %226 = tpu.matmul %225, %214, %cst_72 {dimension_numbers = #tpu.dot_dimension_numbers<[1], [0], [0], [1], [0, 0, 1, 1], [], []>} : vector<16x16xf32>, vector<16x8xf32>, vector<16x8xf32> -> vector<16x8xf32>
    %227 = tpu.concatenate %181, %196, %211, %226 in 1 : vector<16x8xf32>, vector<16x8xf32>, vector<16x8xf32>, vector<16x8xf32> -> vector<16x32xf32>
    %c1_73 = arith.constant 1 : index
    %c0_74 = arith.constant 0 : index
    %c0_75 = arith.constant 0 : index
    %228 = vector.load %arg3[%c1_73, %c0_74, %c0_75] : memref<2x32x32xf32, #tpu.memory_space<vmem>>, vector<1x32x32xf32>
    %229 = vector.shape_cast %228 : vector<1x32x32xf32> to vector<32x32xf32>
    %cst_76 = arith.constant dense<0.000000e+00> : vector<16x32xf32>
    %230 = tpu.matmul %227, %229, %cst_76 {dimension_numbers = #tpu.dot_dimension_numbers<[1], [0], [0], [1], [0, 0, 1, 1], [], []>} : vector<16x32xf32>, vector<32x32xf32>, vector<16x32xf32> -> vector<16x32xf32>
    %231 = vector.broadcast %155 : vector<1x32xf32> to vector<16x32xf32>
    %232 = arith.addf %230, %231 : vector<16x32xf32>
    %233 = arith.addf %151, %232 : vector<16x32xf32>
    %cst_77 = arith.constant dense<0.000000e+00> : vector<16xf32>
    %234 = vector.multi_reduction <add>, %233, %cst_77 [1] : vector<16x32xf32> to vector<16xf32>
    %235 = vector.shape_cast %234 : vector<16xf32> to vector<16x1xf32>
    %cst_78 = arith.constant 3.200000e+01 : f32
    %236 = vector.broadcast %cst_78 : f32 to vector<16x1xf32>
    %237 = arith.divf %235, %236 : vector<16x1xf32>
    %238 = vector.broadcast %237 : vector<16x1xf32> to vector<16x32xf32>
    %239 = arith.subf %233, %238 : vector<16x32xf32>
    %240 = arith.mulf %239, %239 : vector<16x32xf32>
    %cst_79 = arith.constant dense<0.000000e+00> : vector<16xf32>
    %241 = vector.multi_reduction <add>, %240, %cst_79 [1] : vector<16x32xf32> to vector<16xf32>
    %242 = vector.shape_cast %241 : vector<16xf32> to vector<16x1xf32>
    %cst_80 = arith.constant 3.200000e+01 : f32
    %243 = vector.broadcast %cst_80 : f32 to vector<16x1xf32>
    %244 = arith.divf %242, %243 : vector<16x1xf32>
    %245 = vector.broadcast %237 : vector<16x1xf32> to vector<16x32xf32>
    %246 = arith.subf %233, %245 : vector<16x32xf32>
    %cst_81 = arith.constant 9.99999996E-13 : f32
    %247 = vector.broadcast %cst_81 : f32 to vector<16x1xf32>
    %248 = arith.addf %244, %247 : vector<16x1xf32>
    %249 = math.rsqrt %248 : vector<16x1xf32>
    %250 = vector.broadcast %249 : vector<16x1xf32> to vector<16x32xf32>
    %251 = arith.mulf %246, %250 : vector<16x32xf32>
    %252 = vector.broadcast %158 : vector<1x32xf32> to vector<16x32xf32>
    %253 = arith.mulf %251, %252 : vector<16x32xf32>
    %254 = vector.broadcast %159 : vector<1x32xf32> to vector<16x32xf32>
    %255 = arith.addf %253, %254 : vector<16x32xf32>
    %c1_82 = arith.constant 1 : index
    %c0_83 = arith.constant 0 : index
    %c0_84 = arith.constant 0 : index
    %256 = vector.load %arg4[%c1_82, %c0_83, %c0_84] : memref<2x32x64xf32, #tpu.memory_space<vmem>>, vector<1x32x64xf32>
    %257 = vector.shape_cast %256 : vector<1x32x64xf32> to vector<32x64xf32>
    %cst_85 = arith.constant dense<0.000000e+00> : vector<16x64xf32>
    %258 = tpu.matmul %255, %257, %cst_85 {dimension_numbers = #tpu.dot_dimension_numbers<[1], [0], [0], [1], [0, 0, 1, 1], [], []>} : vector<16x32xf32>, vector<32x64xf32>, vector<16x64xf32> -> vector<16x64xf32>
    %259 = vector.broadcast %156 : vector<1x64xf32> to vector<16x64xf32>
    %260 = arith.addf %258, %259 : vector<16x64xf32>
    %261 = arith.mulf %260, %260 : vector<16x64xf32>
    %262 = arith.mulf %260, %261 : vector<16x64xf32>
    %cst_86 = arith.constant 4.471500e-02 : f32
    %263 = vector.broadcast %cst_86 : f32 to vector<16x64xf32>
    %264 = arith.mulf %263, %262 : vector<16x64xf32>
    %265 = arith.addf %260, %264 : vector<16x64xf32>
    %cst_87 = arith.constant 0.797884583 : f32
    %266 = vector.broadcast %cst_87 : f32 to vector<16x64xf32>
    %267 = arith.mulf %266, %265 : vector<16x64xf32>
    %268 = math.tanh %267 : vector<16x64xf32>
    %cst_88 = arith.constant 1.000000e+00 : f32
    %269 = vector.broadcast %cst_88 : f32 to vector<16x64xf32>
    %270 = arith.addf %269, %268 : vector<16x64xf32>
    %cst_89 = arith.constant 5.000000e-01 : f32
    %271 = vector.broadcast %cst_89 : f32 to vector<16x64xf32>
    %272 = arith.mulf %271, %270 : vector<16x64xf32>
    %273 = arith.mulf %260, %272 : vector<16x64xf32>
    %c1_90 = arith.constant 1 : index
    %c0_91 = arith.constant 0 : index
    %c0_92 = arith.constant 0 : index
    %274 = vector.load %arg5[%c1_90, %c0_91, %c0_92] : memref<2x64x32xf32, #tpu.memory_space<vmem>>, vector<1x64x32xf32>
    %275 = vector.shape_cast %274 : vector<1x64x32xf32> to vector<64x32xf32>
    %cst_93 = arith.constant dense<0.000000e+00> : vector<16x32xf32>
    %276 = tpu.matmul %273, %275, %cst_93 {dimension_numbers = #tpu.dot_dimension_numbers<[1], [0], [0], [1], [0, 0, 1, 1], [], []>} : vector<16x64xf32>, vector<64x32xf32>, vector<16x32xf32> -> vector<16x32xf32>
    %277 = vector.broadcast %157 : vector<1x32xf32> to vector<16x32xf32>
    %278 = arith.addf %276, %277 : vector<16x32xf32>
    %279 = arith.addf %255, %278 : vector<16x32xf32>
    %cst_94 = arith.constant dense<0.000000e+00> : vector<16xf32>
    %280 = vector.multi_reduction <add>, %279, %cst_94 [1] : vector<16x32xf32> to vector<16xf32>
    %281 = vector.shape_cast %280 : vector<16xf32> to vector<16x1xf32>
    %cst_95 = arith.constant 3.200000e+01 : f32
    %282 = vector.broadcast %cst_95 : f32 to vector<16x1xf32>
    %283 = arith.divf %281, %282 : vector<16x1xf32>
    %284 = vector.broadcast %283 : vector<16x1xf32> to vector<16x32xf32>
    %285 = arith.subf %279, %284 : vector<16x32xf32>
    %286 = arith.mulf %285, %285 : vector<16x32xf32>
    %cst_96 = arith.constant dense<0.000000e+00> : vector<16xf32>
    %287 = vector.multi_reduction <add>, %286, %cst_96 [1] : vector<16x32xf32> to vector<16xf32>
    %288 = vector.shape_cast %287 : vector<16xf32> to vector<16x1xf32>
    %cst_97 = arith.constant 3.200000e+01 : f32
    %289 = vector.broadcast %cst_97 : f32 to vector<16x1xf32>
    %290 = arith.divf %288, %289 : vector<16x1xf32>
    %291 = vector.broadcast %283 : vector<16x1xf32> to vector<16x32xf32>
    %292 = arith.subf %279, %291 : vector<16x32xf32>
    %cst_98 = arith.constant 9.99999996E-13 : f32
    %293 = vector.broadcast %cst_98 : f32 to vector<16x1xf32>
    %294 = arith.addf %290, %293 : vector<16x1xf32>
    %295 = math.rsqrt %294 : vector<16x1xf32>
    %296 = vector.broadcast %295 : vector<16x1xf32> to vector<16x32xf32>
    %297 = arith.mulf %292, %296 : vector<16x32xf32>
    %298 = vector.broadcast %160 : vector<1x32xf32> to vector<16x32xf32>
    %299 = arith.mulf %297, %298 : vector<16x32xf32>
    %300 = vector.broadcast %161 : vector<1x32xf32> to vector<16x32xf32>
    %301 = arith.addf %299, %300 : vector<16x32xf32>
    %c0_99 = arith.constant 0 : index
    %c0_100 = arith.constant 0 : index
    %302 = vector.load %arg7[%c0_99, %c0_100] : memref<16x32xf32, #tpu.memory_space<vmem>>, vector<16x32xf32>
    tpu.vector_store %arg7[%c0_99, %c0_100], %301 {strides = array<i32>} : memref<16x32xf32, #tpu.memory_space<vmem>>, vector<16x32xf32>,
    return
  }
}

</mosaic_0001>

<bundles_post_ra>
// kernel: tpu_custom_call.1
= control target key start
LH: loop header
LB: loop body
LE: loop exit
PB: predicated region body
PF: predicated region fallthrough
CT: control target
= control target key end

     0   :  { %12 = vsyncpa [#allocation3], 0  ;;  %s3871_s0 = inlined_call_operand.hbm [shape: f32[16,32], index: 0, kind: input, shape index: {}]   ;;  %s3872_s1 = inlined_call_operand.hbm [shape: f32[16,16], index: 1, kind: input, shape index: {}]   ;;  %s3873_s2 = inlined_call_operand.vmem [shape: f32[2,32,96], index: 2, kind: input, shape index: {}]   ;;  %s3874_s3 = inlined_call_operand.vmem [shape: f32[2,32,32], index: 3, kind: input, shape index: {}]   ;;  %s3875_s4 = inlined_call_operand.vmem [shape: f32[2,32,64], index: 4, kind: input, shape index: {}]   ;;  %s3876_s5 = inlined_call_operand.vmem [shape: f32[2,64,32], index: 5, kind: input, shape index: {}]   ;;  %s3877_s6 = inlined_call_operand.hbm [shape: f32[2,8,128], index: 6, kind: input, shape index: {}]   ;;  %s3878_s7 = inlined_call_operand.hbm [shape: f32[16,32], index: 7, kind: output, shape index: {}]  }
   0x1   :  { %13 = vsyncpa [#allocation6], 0 }
   0x2   :  { %14 = vsyncpa [#allocation4], 0  ;;  %s3292_s24 = smov [#allocation5]   ;;  %s3293_s26 = smov [#allocation2]  }
   0x3   :  { %s32_s25 = sshll.u32 %s3292_s24, 4  ;;  %s20_s27 = sshll.u32 %s3293_s26, 4  ;;  %s33_s25 = int_to_ptr.vmem [resolvable:$true] %s32_s25  ;;  %s21_s27 = int_to_ptr.vmem [resolvable:$true] %s20_s27 }
   0x4   :  { %s3214_s28 = scalar_lea.vmem %s33_s25, 256  ;;  %p3219_p1 = scmp.lt.s32.totalorder %s33_s25, %s33_s25 }
   0x5   :  { %p3215_p0 = scmp.ne.s32.totalorder %s33_s25, %s3214_s28  ;;  %p3220_p2 = scmp.lt.s32.totalorder %s3214_s28, %s3214_s28 }
   0x7   :  { %p3221_p3 = por %p3220_p2, %p3219_p1 }
   0x9   :  { %p3222_p4 = pnand %p3221_p3, %p3215_p0 }
   0xb   :  { %3225 = shalt.err (!%p3222_p4)
}
   0xc   :  { %s3294_s29 = smov 128   ;;  %s3295_s30 = smov 8  }
   0xd   :  { %38 = dma.hbm_to_vmem [thread:$0]  %s3872_s1, 256, %s33_s25, [#allocation6], %s3294_s29, %s3294_s29, %s3295_s30  }
   0xe   :  { %s3234_s10 = scalar_lea.vmem %s21_s27, 256  ;;  %p3239_p6 = scmp.lt.s32.totalorder %s21_s27, %s21_s27 }
   0xf   :  { %p3235_p5 = scmp.ne.s32.totalorder %s21_s27, %s3234_s10  ;;  %p3240_p7 = scmp.lt.s32.totalorder %s3234_s10, %s3234_s10 }
  0x11   :  { %p3241_p8 = por %p3240_p7, %p3239_p6 }
  0x13   :  { %p3242_p9 = pnand %p3241_p8, %p3235_p5 }
  0x15   :  { %3245 = shalt.err (!%p3242_p9)
}
  0x16   :  { %26 = dma.hbm_to_vmem [thread:$0]  %s3871_s0, 256, %s21_s27, [#allocation3], %s3294_s29, %s3294_s29, %s3295_s30  }
  0x17   :  { %s3296_s13 = smov [#allocation7]  }
  0x18   :  { %s52_s14 = sshll.u32 %s3296_s13, 4  ;;  %s53_s14 = int_to_ptr.vmem [resolvable:$true] %s52_s14 }
  0x19   :  { %s3254_s15 = scalar_lea.vmem %s53_s14, 256  ;;  %p3259_p11 = scmp.lt.s32.totalorder %s53_s14, %s53_s14 }
  0x1a   :  { %p3255_p10 = scmp.ne.s32.totalorder %s53_s14, %s3254_s15  ;;  %p3260_p12 = scmp.lt.s32.totalorder %s3254_s15, %s3254_s15 }
  0x1c   :  { %p3261_p13 = por %p3260_p12, %p3259_p11 }
  0x1e   :  { %p3262_p0 = pnand %p3261_p13, %p3255_p10 }
  0x20   :  { %3265 = shalt.err (!%p3262_p0)
}
  0x21   :  { %58 = dma.hbm_to_vmem [thread:$0]  %s3877_s6, 256, %s53_s14, [#allocation6], %s3294_s29, %s3294_s29, %s3295_s30  }
  0x22   :  { %3286 = dma.done.wait [#allocation3], 256  }
  0x23   :  { %3287 = vsyncadd [#allocation3], 4294967040 }
  0x24   :  { %3288 = dma.done.wait [#allocation6], 512  }
  0x25   :  { %3289 = vsyncadd [#allocation6], 4294966784  ;;  %vm81_vm0 = vcmask 261120   ;;  %v76_v0 = vld [vmem:[%s3873_s2 + $0x18] sm:$0xff]  ;;  %v75_v1 = vld [vmem:[%s3873_s2 + $0x10] sm:$0xff]  ;;  %v77_v6 = vlaneseq  ;;  %vm169_vm1 = vcmask 64512  }
  0x26   :  { %2881 = vmatprep.subr.mxu1 %v76_v0  ;;  %v3375_v2 = vld [vmem:[#allocation2] sm:$0xff]  ;;  %v74_v3 = vld [vmem:[%s3873_s2 + $0x8] sm:$0xff]  ;;  %s3297_s23 = smov 88   ;;  %s3298_s24 = smov 96   ;;  %v3427_v21 = vld [vmem:[#allocation5 + $0x8] sm:$0xff]  ;;  %vm253_vm2 = vcmask 130048  }
  0x27   :  { %2882 = vmatpush3.msra.mxu1 %v76_v0  ;;  %2889 = vmatprep.mubr.msk.f32.mxu1 %vm81_vm0, %v3375_v2  ;;  %v73_v4 = vld [vmem:[%s3873_s2] sm:$0xff]  ;;  %v3385_v5 = vld [vmem:[#allocation2 + $0x8] sm:$0xff]  ;;  %v3389_v7 = vshrl.u32 %v77_v6, 7  ;;  %s3299_s25 = smov 120   ;;  %v3429_v23 = vld [vmem:[#allocation5] sm:$0xff]  ;;  %s3300_s26 = smov 64  }
  0x28   :  { %2883 = vmatprep.subr.mxu1 %v75_v1  ;;  %v3392_v9 = vld [vmem:[#allocation7] sm:$0xff]  ;;  %s3301_s27 = smov 56   ;;  %s3302_s28 = smov 80   ;;  %vm991_vm3 = vcmask 195584   ;;  %vm1243_vm4 = vcmask 523264  }
  0x29   :  { %2884 = vmatpush3.msra.mxu1 %v75_v1  ;;  %v79_v8 = vsub.s32 0, %v3389_v7  ;;  %s3303_s8 = smov 112   ;;  %s3304_s9 = smov 48  }
  0x2a   :  { %2885 = vmatprep.subr.mxu1 %v74_v3  ;;  %s3305_s10 = smov 72   ;;  %s3306_s11 = smov 104  }
  0x2b   :  { %2886 = vmatpush3.msra.mxu1 %v74_v3  ;;  %v80_v10 = vrot.slane %v3392_v9, %v79_v8  ;;  %s3307_s12 = smov 40   ;;  %s3308_s13 = smov 16  }
  0x2c   :  { %2887 = vmatprep.subr.mxu1 %v73_v4  ;;  %s3309_s20 = smov 24  }
  0x2d   :  { %2888 = vmatpush3.msra.mxu1 %v73_v4 }
  0x2e   :  { %2890 = vmatmul.mubr.msk.f32.vlgmr.msra.gmra.mxu1 %vm81_vm0, %v3385_v5 }
  0xee   :  { %v2891_v11 = vpop.f32.mrf.mxu1 }
  0xef   :  { %v3397_v12 = vadd.f32 %v2891_v11, %v80_v10 }
  0xf0   :  { %v154_v13 = vpop.f32.mrf.mxu1 }
  0xf1   :  { %v3399_v14 = vadd.f32 %v154_v13, %v80_v10  ;;  %369 = vrot.lane.b32.xlu1 %v3397_v12, %s3297_s23  ;;  %167 = vrot.lane.b32.xlu0 %v3397_v12, %s3298_s24 }
  0xf3   :  { %2896 = vmatprep.mubr.msk.f32.mxu1 %vm169_vm1, %v3399_v14 }
  0xf5   :  { %367 = vrot.lane.b32.xlu1 %v3399_v14, %s3297_s23  ;;  %165 = vrot.lane.b32.xlu0 %v3399_v14, %s3298_s24 }
  0xf9   :  { %365 = vrot.lane.b32.xlu1 %v3397_v12, %s3299_s25  ;;  %363 = vrot.lane.b32.xlu0 %v3399_v14, %s3299_s25 }
 0x163   :  { %v168_v15 = vpop.permute.xlu0 %167  ;;  %v370_v16 = vpop.permute.xlu1 %369 }
 0x164   :  { %2892 = vmatprep.subr.msk.mxu1 %vm169_vm1, %v168_v15 }
 0x165   :  { %2893 = vmatpush3.xpose.msk.msra.mxu1 %vm169_vm1, %v168_v15 }
 0x167   :  { %v166_v17 = vpop.permute.xlu0 %165  ;;  %v368_v19 = vpop.permute.xlu1 %367 }
 0x168   :  { %2894 = vmatprep.subr.msk.mxu1 %vm169_vm1, %v166_v17 }
 0x169   :  { %2895 = vmatpush3.xpose.msk.msra.mxu1 %vm169_vm1, %v166_v17 }
 0x16a   :  { %2906 = vmatprep.subr.msk.mxu1 %vm169_vm1, %v370_v16 }
 0x16b   :  { %v364_v18 = vpop.permute.xlu0 %363  ;;  %v366_v20 = vpop.permute.xlu1 %365 }
 0x16c   :  { %2897 = vmatmul.mubr.msk.f32.vlgmr.msra.gmra.mxu1 %vm169_vm1, %v3397_v12 }
 0x16d   :  { %2907 = vmatpush3.xpose.msk.msra.mxu1 %vm169_vm1, %v370_v16  ;;  %2910 = vmatprep.mubr.msk.f32.mxu1 %vm169_vm1, %v364_v18 }
 0x16e   :  { %2908 = vmatprep.subr.msk.mxu1 %vm169_vm1, %v368_v19 }
 0x171   :  { %2909 = vmatpush3.xpose.msk.msra.mxu1 %vm169_vm1, %v368_v19 }
 0x174   :  { %2911 = vmatmul.mubr.msk.f32.vlgmr.msra.gmra.mxu1 %vm169_vm1, %v366_v20 }
 0x22c   :  { %v2898_v22 = vpop.f32.mrf.mxu1 }
 0x22d   :  { %v250_v24 = vadd.f32 %v2898_v22, %v3427_v21 }
 0x22e   :  { %v244_v25 = vpop.f32.mrf.mxu1 }
 0x22f   :  { %v245_v26 = vadd.f32 %v244_v25, %v3429_v23  ;;  %v257_v27 = vsel %vm253_vm2, %v250_v24, -inf }
 0x230   :  { %258 = vmax.xlane.f32.xlu1 %v257_v27 }
 0x231   :  { %v254_v28 = vsel %vm253_vm2, %v245_v26, -inf }
 0x232   :  { %255 = vmax.xlane.f32.xlu0 %v254_v28 }
 0x234   :  { %v2912_v29 = vpop.f32.mrf.mxu1 }
 0x235   :  { %v451_v32 = vadd.f32 %v2912_v29, %v3427_v21 }
 0x236   :  { %v445_v30 = vpop.f32.mrf.mxu1 }
 0x237   :  { %v446_v31 = vadd.f32 %v445_v30, %v3429_v23  ;;  %v457_v34 = vsel %vm253_vm2, %v451_v32, -inf }
 0x239   :  { %v454_v33 = vsel %vm253_vm2, %v446_v31, -inf }
 0x23a   :  { %455 = vmax.xlane.f32.xlu0 %v454_v33 }
 0x23e   :  { %458 = vmax.xlane.f32.xlu0 %v457_v34 }
 0x241   :  { %278 = vrot.lane.b32.xlu1 %v3397_v12, %s3300_s26 }
 0x245   :  { %478 = vrot.lane.b32.xlu1 %v3397_v12, %s3301_s27 }
 0x249   :  { %476 = vrot.lane.b32.xlu1 %v3399_v14, %s3301_s27 }
 0x254   :  { %276 = vrot.lane.b32.xlu0 %v3399_v14, %s3300_s26 }
 0x2b9   :  { %v259_v35 = vpop.xlane.xlu1 %258 }
 0x2ba   :  { %v261_v36 = vsub.f32 %v250_v24, %v259_v35 }
 0x2bb   :  { %v256_v37 = vpop.xlane.xlu0 %255 }
 0x2bc   :  { %v264_v38 = vmul.f32 1.442695, %v261_v36  ;;  %v260_v39 = vsub.f32 %v245_v26, %v256_v37 }
 0x2bd   :  { %v279_v40 = vpop.permute.xlu1 %278 }
 0x2be   :  { %3116 = vpow2.f32 %v264_v38  ;;  %v262_v41 = vmul.f32 1.442695, %v260_v39  ;;  %2899 = vmatprep.subr.mxu0 %v279_v40 }
 0x2bf   :  { %2900 = vmatpush3.msra.mxu0 %v279_v40 }
 0x2c0   :  { %3118 = vpow2.f32 %v262_v41 }
 0x2c1   :  { %v479_v50 = vpop.permute.xlu1 %478 }
 0x2c3   :  { %v456_v42 = vpop.xlane.xlu0 %455 }
 0x2c4   :  { %v460_v54 = vsub.f32 %v446_v31, %v456_v42 }
 0x2c5   :  { %v477_v58 = vpop.permute.xlu1 %476 }
 0x2c6   :  { %v462_v55 = vmul.f32 1.442695, %v460_v54 }
 0x2c7   :  { %v459_v43 = vpop.xlane.xlu0 %458 }
 0x2c8   :  { %v461_v44 = vsub.f32 %v451_v32, %v459_v43 }
 0x2ca   :  { %v464_v45 = vmul.f32 1.442695, %v461_v44 }
 0x2cb   :  { %v3117_v46 = vpop.eup %3116  ;;  %v277_v47 = vpop.permute.xlu0 %276 }
 0x2cc   :  { %3120 = vpow2.f32 %v464_v45  ;;  %2901 = vmatprep.subr.mxu0 %v277_v47  ;;  %v269_v48 = vsel %vm253_vm2, %v3117_v46, 0.0 }
 0x2cd   :  { %v3119_v49 = vpop.eup %3118  ;;  %270 = vadd.xlane.f32.xlu0 %v269_v48  ;;  %2902 = vmatpush3.msra.mxu0 %v277_v47  ;;  %3122 = vpow2.f32 %v462_v55 }
 0x2ce   :  { %2913 = vmatprep.subr.mxu0 %v479_v50  ;;  %v266_v51 = vsel %vm253_vm2, %v3119_v49, 0.0 }
 0x2cf   :  { %267 = vadd.xlane.f32.xlu1 %v266_v51 }
 0x2d9   :  { %v3121_v52 = vpop.eup %3120 }
 0x2da   :  { %v469_v53 = vsel %vm253_vm2, %v3121_v52, 0.0  ;;  %v3123_v56 = vpop.eup %3122 }
 0x2db   :  { %470 = vadd.xlane.f32.xlu0 %v469_v53  ;;  %v466_v57 = vsel %vm253_vm2, %v3123_v56, 0.0 }
 0x2e0   :  { %567 = vrot.lane.b32.xlu1 %v3399_v14, %s3302_s28 }
 0x2f1   :  { %569 = vrot.lane.b32.xlu0 %v3397_v12, %s3302_s28 }
 0x2f5   :  { %563 = vrot.lane.b32.xlu0 %v3399_v14, %s3303_s8 }
 0x304   :  { %467 = vadd.xlane.f32.xlu1 %v466_v57 }
 0x315   :  { %565 = vrot.lane.b32.xlu1 %v3397_v12, %s3303_s8 }
 0x356   :  { %v271_v59 = vpop.xlane.xlu0 %270 }
 0x357   :  { %3124 = vrcp.f32 %v271_v59 }
 0x358   :  { %v268_v60 = vpop.xlane.xlu1 %267 }
 0x359   :  { %3126 = vrcp.f32 %v268_v60 }
 0x35c   :  { %v568_v4 = vpop.permute.xlu1 %567 }
 0x364   :  { %v3125_v61 = vpop.eup %3124  ;;  %v471_v63 = vpop.xlane.xlu0 %470 }
 0x365   :  { %v275_v1 = vmul.f32 %v3125_v61, %v3117_v46  ;;  %3128 = vrcp.f32 %v471_v63 }
 0x366   :  { %v3127_v62 = vpop.eup %3126 }
 0x367   :  { %v273_v0 = vmul.f32 %v3127_v62, %v3119_v49 }
 0x368   :  { %v570_v3 = vpop.permute.xlu0 %569 }
 0x369   :  { %2903 = vmatprep.mubr.msk.f32.mxu0 %vm253_vm2, %v273_v0 }
 0x36a   :  { %2904 = vmatmul.mubr.msk.f32.vlgmr.msra.gmra.mxu0 %vm253_vm2, %v275_v1 }
 0x36b   :  { %2914 = vmatpush3.msra.mxu0 %v479_v50 }
 0x36c   :  { %2915 = vmatprep.subr.mxu0 %v477_v58  ;;  %v564_v16 = vpop.permute.xlu0 %563 }
 0x36d   :  { %2916 = vmatpush3.msra.mxu0 %v477_v58 }
 0x36e   :  { %2920 = vmatprep.subr.msk.mxu0 %vm169_vm1, %v570_v3 }
 0x372   :  { %v3129_v10 = vpop.eup %3128 }
 0x373   :  { %v475_v15 = vmul.f32 %v3129_v10, %v3121_v52 }
 0x38d   :  { %v468_v6 = vpop.xlane.xlu1 %467 }
 0x38e   :  { %3130 = vrcp.f32 %v468_v6 }
 0x391   :  { %v566_v17 = vpop.permute.xlu1 %565 }
 0x39b   :  { %v3131_v11 = vpop.eup %3130 }
 0x39c   :  { %v473_v13 = vmul.f32 %v3131_v11, %v3123_v56 }
 0x39e   :  { %2917 = vmatprep.mubr.msk.f32.mxu0 %vm253_vm2, %v473_v13 }
 0x39f   :  { %2918 = vmatmul.mubr.msk.f32.vlgmr.msra.gmra.mxu0 %vm253_vm2, %v475_v15 }
 0x3a0   :  { %2921 = vmatpush3.xpose.msk.msra.mxu0 %vm169_vm1, %v570_v3  ;;  %2924 = vmatprep.mubr.msk.f32.mxu0 %vm169_vm1, %v564_v16 }
 0x3a1   :  { %2922 = vmatprep.subr.msk.mxu0 %vm169_vm1, %v568_v4 }
 0x3a4   :  { %2923 = vmatpush3.xpose.msk.msra.mxu0 %vm169_vm1, %v568_v4 }
 0x3a7   :  { %2925 = vmatmul.mubr.msk.f32.vlgmr.msra.gmra.mxu0 %vm169_vm1, %v566_v17 }
 0x42a   :  { %v3469_v18 = vpop.f32.mrf.mxu0 }
 0x42c   :  { %v3471_v19 = vpop.f32.mrf.mxu0 }
 0x45f   :  { %v3473_v20 = vpop.f32.mrf.mxu0 }
 0x461   :  { %v3475_v22 = vpop.f32.mrf.mxu0 }
 0x467   :  { %v2926_v24 = vpop.f32.mrf.mxu0 }
 0x468   :  { %v651_v25 = vadd.f32 %v2926_v24, %v3427_v21  ;;  %v996_v24 = vld [vmem:[%s3874_s3 + $0x10] sm:$0xff] }
 0x469   :  { %v645_v26 = vpop.f32.mrf.mxu0 }
 0x46a   :  { %v646_v27 = vadd.f32 %v645_v26, %v3429_v23  ;;  %v657_v28 = vsel %vm253_vm2, %v651_v25, -inf  ;;  %v994_v26 = vld [vmem:[%s3874_s3] sm:$0xff] }
 0x46b   :  { %658 = vmax.xlane.f32.xlu1 %v657_v28 }
 0x46c   :  { %v654_v29 = vsel %vm253_vm2, %v646_v27, -inf }
 0x46d   :  { %655 = vmax.xlane.f32.xlu0 %v654_v29 }
 0x47c   :  { %678 = vrot.lane.b32.xlu1 %v3397_v12, %s3304_s9 }
 0x480   :  { %769 = vrot.lane.b32.xlu1 %v3397_v12, %s3305_s10 }
 0x484   :  { %767 = vrot.lane.b32.xlu1 %v3399_v14, %s3305_s10 }
 0x488   :  { %765 = vrot.lane.b32.xlu1 %v3397_v12, %s3306_s11 }
 0x4f4   :  { %v659_v30 = vpop.xlane.xlu1 %658 }
 0x4f5   :  { %v661_v31 = vsub.f32 %v651_v25, %v659_v30  ;;  %v995_v25 = vld [vmem:[%s3874_s3 + $0x8] sm:$0xff] }
 0x4f6   :  { %v656_v32 = vpop.xlane.xlu0 %655 }
 0x4f7   :  { %v664_v33 = vmul.f32 1.442695, %v661_v31  ;;  %v660_v34 = vsub.f32 %v646_v27, %v656_v32 }
 0x4f8   :  { %v679_v35 = vpop.permute.xlu1 %678 }
 0x4f9   :  { %3132 = vpow2.f32 %v664_v33  ;;  %v662_v36 = vmul.f32 1.442695, %v660_v34  ;;  %2927 = vmatprep.subr.mxu1 %v679_v35 }
 0x4fa   :  { %2928 = vmatpush3.msra.mxu1 %v679_v35 }
 0x4fb   :  { %3134 = vpow2.f32 %v662_v36 }
 0x4fc   :  { %v770_v44 = vpop.permute.xlu1 %769 }
 0x500   :  { %v768_v50 = vpop.permute.xlu1 %767 }
 0x504   :  { %v766_v51 = vpop.permute.xlu1 %765 }
 0x506   :  { %v3133_v37 = vpop.eup %3132 }
 0x507   :  { %v669_v38 = vsel %vm253_vm2, %v3133_v37, 0.0 }
 0x508   :  { %v3135_v39 = vpop.eup %3134  ;;  %670 = vadd.xlane.f32.xlu0 %v669_v38 }
 0x509   :  { %v666_v40 = vsel %vm253_vm2, %v3135_v39, 0.0 }
 0x50c   :  { %667 = vadd.xlane.f32.xlu0 %v666_v40 }
 0x522   :  { %676 = vrot.lane.b32.xlu0 %v3399_v14, %s3304_s9 }
 0x526   :  { %763 = vrot.lane.b32.xlu0 %v3399_v14, %s3306_s11 }
 0x591   :  { %v671_v41 = vpop.xlane.xlu0 %670 }
 0x592   :  { %3136 = vrcp.f32 %v671_v41 }
 0x595   :  { %v668_v42 = vpop.xlane.xlu0 %667 }
 0x596   :  { %3138 = vrcp.f32 %v668_v42 }
 0x599   :  { %v677_v43 = vpop.permute.xlu0 %676 }
 0x59a   :  { %2929 = vmatprep.subr.mxu1 %v677_v43 }
 0x59b   :  { %2930 = vmatpush3.msra.mxu1 %v677_v43 }
 0x59c   :  { %2934 = vmatprep.subr.msk.mxu1 %vm169_vm1, %v770_v44 }
 0x59d   :  { %v764_v49 = vpop.permute.xlu0 %763 }
 0x59f   :  { %v3137_v45 = vpop.eup %3136 }
 0x5a0   :  { %v675_v48 = vmul.f32 %v3137_v45, %v3133_v37 }
 0x5a3   :  { %v3139_v46 = vpop.eup %3138 }
 0x5a4   :  { %v673_v47 = vmul.f32 %v3139_v46, %v3135_v39 }
 0x5a6   :  { %2931 = vmatprep.mubr.msk.f32.mxu1 %vm253_vm2, %v673_v47 }
 0x5a7   :  { %2932 = vmatmul.mubr.msk.f32.vlgmr.msra.gmra.mxu1 %vm253_vm2, %v675_v48 }
 0x5a8   :  { %2935 = vmatpush3.xpose.msk.msra.mxu1 %vm169_vm1, %v770_v44  ;;  %2938 = vmatprep.mubr.msk.f32.mxu1 %vm169_vm1, %v764_v49 }
 0x5a9   :  { %2936 = vmatprep.subr.msk.mxu1 %vm169_vm1, %v768_v50 }
 0x5ac   :  { %2937 = vmatpush3.xpose.msk.msra.mxu1 %vm169_vm1, %v768_v50 }
 0x5af   :  { %2939 = vmatmul.mubr.msk.f32.vlgmr.msra.gmra.mxu1 %vm169_vm1, %v766_v51 }
 0x667   :  { %v2933_v52 = vpop.f32.mrf.mxu1 }
 0x669   :  { %v754_v53 = vpop.f32.mrf.mxu1 }
 0x66f   :  { %v2940_v54 = vpop.f32.mrf.mxu1 }
 0x670   :  { %v851_v55 = vadd.f32 %v2940_v54, %v3427_v21 }
 0x671   :  { %v845_v56 = vpop.f32.mrf.mxu1 }
 0x672   :  { %v846_v57 = vadd.f32 %v845_v56, %v3429_v23  ;;  %v857_v58 = vsel %vm253_vm2, %v851_v55, -inf }
 0x673   :  { %858 = vmax.xlane.f32.xlu1 %v857_v58  ;;  %v1126_v58 = vld [vmem:[%s3875_s4 + $0x10] sm:$0xff] }
 0x674   :  { %v854_v59 = vsel %vm253_vm2, %v846_v57, -inf }
 0x675   :  { %855 = vmax.xlane.f32.xlu0 %v854_v59  ;;  %v1125_v59 = vld [vmem:[%s3875_s4 + $0x8] sm:$0xff] }
 0x684   :  { %878 = vrot.lane.b32.xlu1 %v3397_v12, %s3307_s12 }
 0x688   :  { %965 = vrot.lane.b32.xlu1 %v3475_v22, %s3295_s30 }
 0x68c   :  { %967 = vrot.lane.b32.xlu1 %v3473_v20, %s3295_s30 }
 0x690   :  { %975 = vrot.lane.b32.xlu1 %v2933_v52, %s3308_s13 }
 0x6fc   :  { %v859_v60 = vpop.xlane.xlu1 %858 }
 0x6fd   :  { %v861_v61 = vsub.f32 %v851_v55, %v859_v60  ;;  %v1124_v60 = vld [vmem:[%s3875_s4] sm:$0xff] }
 0x6fe   :  { %v856_v62 = vpop.xlane.xlu0 %855 }
 0x6ff   :  { %v864_v63 = vmul.f32 1.442695, %v861_v61  ;;  %v860_v0 = vsub.f32 %v846_v57, %v856_v62 }
 0x700   :  { %v879_v1 = vpop.permute.xlu1 %878 }
 0x701   :  { %3140 = vpow2.f32 %v864_v63  ;;  %v862_v3 = vmul.f32 1.442695, %v860_v0  ;;  %2941 = vmatprep.subr.mxu0 %v879_v1 }
 0x702   :  { %2942 = vmatpush3.msra.mxu0 %v879_v1 }
 0x703   :  { %3142 = vpow2.f32 %v862_v3 }
 0x704   :  { %v966_v29 = vpop.permute.xlu1 %965 }
 0x705   :  { %v987_v33 = vsel %vm169_vm1, %v3471_v19, %v966_v29  ;;  %v1000_v19 = vsub.s32 1, %v3389_v7  ;;  %v1233_v29 = vld [vmem:[%s3876_s5 + $0x10] sm:$0xff] }
 0x707   :  { %v1001_v41 = vrot.slane %v3392_v9, %v1000_v19 }
 0x708   :  { %v968_v30 = vpop.permute.xlu1 %967 }
 0x709   :  { %v988_v35 = vsel %vm169_vm1, %v3469_v18, %v968_v30  ;;  %v1232_v30 = vld [vmem:[%s3876_s5 + $0x8] sm:$0xff] }
 0x70c   :  { %v976_v31 = vpop.permute.xlu1 %975 }
 0x70d   :  { %v990_v38 = vsel %vm253_vm2, %v988_v35, %v976_v31  ;;  %v1231_v31 = vld [vmem:[%s3876_s5] sm:$0xff] }
 0x70e   :  { %v3141_v12 = vpop.eup %3140 }
 0x70f   :  { %v869_v4 = vsel %vm253_vm2, %v3141_v12, 0.0 }
 0x710   :  { %v3143_v6 = vpop.eup %3142  ;;  %870 = vadd.xlane.f32.xlu0 %v869_v4  ;;  %v1120_v4 = vsub.s32 5, %v3389_v7 }
 0x711   :  { %v866_v10 = vsel %vm253_vm2, %v3143_v6, 0.0 }
 0x714   :  { %867 = vadd.xlane.f32.xlu0 %v866_v10 }
 0x72a   :  { %876 = vrot.lane.b32.xlu0 %v3399_v14, %s3307_s12  ;;  %v997_v14 = vld [vmem:[%s3874_s3 + $0x18] sm:$0xff] }
 0x72e   :  { %973 = vrot.lane.b32.xlu0 %v754_v53, %s3308_s13 }
 0x799   :  { %v871_v11 = vpop.xlane.xlu0 %870 }
 0x79a   :  { %3144 = vrcp.f32 %v871_v11 }
 0x79d   :  { %v868_v13 = vpop.xlane.xlu0 %867 }
 0x79e   :  { %3146 = vrcp.f32 %v868_v13  ;;  %v1121_v13 = vrot.slane %v3392_v9, %v1120_v4 }
 0x7a1   :  { %v877_v15 = vpop.permute.xlu0 %876 }
 0x7a2   :  { %2943 = vmatprep.subr.mxu0 %v877_v15 }
 0x7a3   :  { %2944 = vmatpush3.msra.mxu0 %v877_v15 }
 0x7a4   :  { %2948 = vmatprep.subr.mxu0 %v997_v14 }
 0x7a5   :  { %v974_v32 = vpop.permute.xlu0 %973 }
 0x7a6   :  { %v989_v36 = vsel %vm253_vm2, %v987_v33, %v974_v32  ;;  %v1130_v32 = vsub.s32 2, %v3389_v7 }
 0x7a7   :  { %v3145_v16 = vpop.eup %3144 }
 0x7a8   :  { %v875_v22 = vmul.f32 %v3145_v16, %v3141_v12  ;;  %v1114_v12 = vsub.s32 4, %v3389_v7  ;;  %v1131_v33 = vrot.slane %v3392_v9, %v1130_v32 }
 0x7ab   :  { %v3147_v17 = vpop.eup %3146 }
 0x7ac   :  { %v873_v20 = vmul.f32 %v3147_v17, %v3143_v6  ;;  %v1115_v6 = vrot.slane %v3392_v9, %v1114_v12 }
 0x7ae   :  { %2945 = vmatprep.mubr.msk.f32.mxu0 %vm253_vm2, %v873_v20 }
 0x7af   :  { %2946 = vmatmul.mubr.msk.f32.vlgmr.msra.gmra.mxu0 %vm253_vm2, %v875_v22 }
 0x7b0   :  { %2949 = vmatpush3.msra.mxu0 %v997_v14 }
 0x7b1   :  { %2950 = vmatprep.subr.mxu0 %v996_v24 }
 0x7b2   :  { %2951 = vmatpush3.msra.mxu0 %v996_v24  ;;  %v1238_v24 = vld [vmem:[%s3876_s5 + $0x38] sm:$0xff] }
 0x7b3   :  { %2952 = vmatprep.subr.mxu0 %v995_v25 }
 0x7b4   :  { %2953 = vmatpush3.msra.mxu0 %v995_v25  ;;  %v1237_v25 = vld [vmem:[%s3876_s5 + $0x30] sm:$0xff] }
 0x7b5   :  { %2954 = vmatprep.subr.mxu0 %v994_v26 }
 0x7b6   :  { %2955 = vmatpush3.msra.mxu0 %v994_v26  ;;  %v1236_v26 = vld [vmem:[%s3876_s5 + $0x28] sm:$0xff] }
 0x7b7   :  { %2970 = vmatprep.subr.mxu0 %v1238_v24 }
 0x86f   :  { %v2947_v27 = vpop.f32.mrf.mxu0 }
 0x870   :  { %983 = vrot.lane.b32.xlu1 %v2947_v27, %s3309_s20  ;;  %v1235_v27 = vld [vmem:[%s3876_s5 + $0x20] sm:$0xff] }
 0x871   :  { %v954_v28 = vpop.f32.mrf.mxu0 }
 0x872   :  { %981 = vrot.lane.b32.xlu0 %v954_v28, %s3309_s20  ;;  %v1234_v28 = vld [vmem:[%s3876_s5 + $0x18] sm:$0xff] }
 0x8e2   :  { %v984_v34 = vpop.permute.xlu1 %983 }
 0x8e3   :  { %v993_v40 = vsel %vm991_vm3, %v990_v38, %v984_v34 }
 0x8e4   :  { %v982_v37 = vpop.permute.xlu0 %981 }
 0x8e5   :  { %v992_v39 = vsel %vm991_vm3, %v989_v36, %v982_v37 }
 0x8e6   :  { %2956 = vmatprep.mubr.msk.f32.mxu0 %vm81_vm0, %v992_v39 }
 0x8e7   :  { %2957 = vmatmul.mubr.msk.f32.vlgmr.msra.gmra.mxu0 %vm81_vm0, %v993_v40 }
 0x8e8   :  { %2971 = vmatpush3.msra.mxu0 %v1238_v24 }
 0x8e9   :  { %2972 = vmatprep.subr.mxu0 %v1237_v25 }
 0x8ea   :  { %2973 = vmatpush3.msra.mxu0 %v1237_v25 }
 0x8eb   :  { %2974 = vmatprep.subr.mxu0 %v1236_v26 }
 0x8ec   :  { %2975 = vmatpush3.msra.mxu0 %v1236_v26 }
 0x8ed   :  { %2976 = vmatprep.subr.mxu0 %v1235_v27 }
 0x8ee   :  { %2977 = vmatpush3.msra.mxu0 %v1235_v27 }
 0x8ef   :  { %2978 = vmatprep.subr.mxu0 %v1234_v28 }
 0x8f0   :  { %2979 = vmatpush3.msra.mxu0 %v1234_v28 }
 0x8f1   :  { %2980 = vmatprep.subr.mxu0 %v1233_v29 }
 0x8f2   :  { %2981 = vmatpush3.msra.mxu0 %v1233_v29 }
 0x8f3   :  { %2982 = vmatprep.subr.mxu0 %v1232_v30 }
 0x8f4   :  { %2983 = vmatpush3.msra.mxu0 %v1232_v30  ;;  %v1355_v30 = vsub.s32 6, %v3389_v7 }
 0x8f5   :  { %2984 = vmatprep.subr.mxu0 %v1231_v31 }
 0x8f6   :  { %2985 = vmatpush3.msra.mxu0 %v1231_v31 }
 0x9a7   :  { %v2958_v18 = vpop.f32.mrf.mxu0 }
 0x9a8   :  { %v1080_v42 = vadd.f32 %v2958_v18, %v1001_v41 }
 0x9a9   :  { %v1074_v43 = vpop.f32.mrf.mxu0 }
 0x9aa   :  { %v1075_v44 = vadd.f32 %v1074_v43, %v1001_v41  ;;  %v1084_v45 = vadd.f32 %v1080_v42, %v3385_v5 }
 0x9ac   :  { %v1088_v46 = vsel %vm81_vm0, %v1084_v45, 0.0  ;;  %v1083_v47 = vadd.f32 %v1075_v44, %v3375_v2  ;;  %v1127_v2 = vld [vmem:[%s3875_s4 + $0x18] sm:$0xff] }
 0x9ad   :  { %1089 = vadd.xlane.f32.xlu1 %v1088_v46  ;;  %2959 = vmatprep.subr.mxu1 %v1127_v2 }
 0x9ae   :  { %v1085_v48 = vsel %vm81_vm0, %v1083_v47, 0.0  ;;  %2960 = vmatpush3.msra.mxu1 %v1127_v2 }
 0x9af   :  { %1086 = vadd.xlane.f32.xlu0 %v1085_v48  ;;  %2961 = vmatprep.subr.mxu1 %v1126_v58 }
 0x9b0   :  { %2962 = vmatpush3.msra.mxu1 %v1126_v58 }
 0x9b1   :  { %2963 = vmatprep.subr.mxu1 %v1125_v59 }
 0x9b2   :  { %2964 = vmatpush3.msra.mxu1 %v1125_v59 }
 0x9b3   :  { %2965 = vmatprep.subr.mxu1 %v1124_v60 }
 0x9b4   :  { %2966 = vmatpush3.msra.mxu1 %v1124_v60 }
 0xa36   :  { %v1090_v49 = vpop.xlane.xlu1 %1089 }
 0xa37   :  { %v1093_v50 = vmul.f32 0.03125, %v1090_v49 }
 0xa38   :  { %v1087_v51 = vpop.xlane.xlu0 %1086 }
 0xa39   :  { %v1092_v52 = vmul.f32 0.03125, %v1087_v51  ;;  %v1095_v53 = vsub.f32 %v1084_v45, %v1093_v50 }
 0xa3b   :  { %v1094_v54 = vsub.f32 %v1083_v47, %v1092_v52  ;;  %v1097_v57 = vmul.f32 %v1095_v53, %v1095_v53 }
 0xa3d   :  { %v1096_v55 = vmul.f32 %v1094_v54, %v1094_v54  ;;  %v1101_v5 = vsel %vm81_vm0, %v1097_v57, 0.0 }
 0xa3f   :  { %v1098_v56 = vsel %vm81_vm0, %v1096_v55, 0.0  ;;  %v1241_v55 = vsub.s32 3, %v3389_v7 }
 0xa40   :  { %1099 = vadd.xlane.f32.xlu0 %v1098_v56 }
 0xa41   :  { %v1242_v56 = vrot.slane %v3392_v9, %v1241_v55 }
 0xa44   :  { %1102 = vadd.xlane.f32.xlu0 %v1101_v5 }
 0xac9   :  { %v1100_v61 = vpop.xlane.xlu0 %1099 }
 0xaca   :  { %v1104_v62 = vmul.f32 0.03125, %v1100_v61 }
 0xacc   :  { %v1106_v63 = vadd.f32 1e-12, %v1104_v62 }
 0xacd   :  { %v1103_v0 = vpop.xlane.xlu0 %1102 }
 0xace   :  { %3148 = vrsqrt.f32 %v1106_v63  ;;  %v1105_v1 = vmul.f32 0.03125, %v1103_v0 }
 0xad0   :  { %v1107_v3 = vadd.f32 1e-12, %v1105_v1 }
 0xad2   :  { %3150 = vrsqrt.f32 %v1107_v3 }
 0xadb   :  { %v3149_v10 = vpop.eup %3148 }
 0xadc   :  { %v1110_v11 = vmul.f32 %v3149_v10, %v1094_v54 }
 0xade   :  { %v1116_v15 = vmul.f32 %v1115_v6, %v1110_v11 }
 0xadf   :  { %v3151_v16 = vpop.eup %3150 }
 0xae0   :  { %v1111_v17 = vmul.f32 %v3151_v16, %v1095_v53  ;;  %v3575_v20 = vadd.f32 %v1121_v13, %v1116_v15 }
 0xae2   :  { %v1117_v22 = vmul.f32 %v1115_v6, %v1111_v17  ;;  %2967 = vmatprep.mubr.msk.f32.mxu1 %vm81_vm0, %v3575_v20  ;;  %v2712_v17 = vld [vmem:[%s3873_s2 + $0x38] sm:$0xff] }
 0xae3   :  { %2989 = vmatprep.subr.mxu1 %v2712_v17 }
 0xae4   :  { %v1123_v14 = vadd.f32 %v1121_v13, %v1117_v22  ;;  %v2710_v22 = vld [vmem:[%s3873_s2 + $0x28] sm:$0xff] }
 0xae6   :  { %2968 = vmatmul.mubr.msk.f32.vlgmr.msra.gmra.mxu1 %vm81_vm0, %v1123_v14 }
 0xae7   :  { %2990 = vmatpush3.msra.mxu1 %v2712_v17 }
 0xba6   :  { %v2969_v34 = vpop.f32.mrf.mxu1 }
 0xba7   :  { %v1210_v35 = vadd.f32 %v2969_v34, %v1131_v33  ;;  %v1361_v34 = vsub.s32 7, %v3389_v7 }
 0xba8   :  { %v1204_v36 = vpop.f32.mrf.mxu1 }
 0xba9   :  { %v1214_v37 = vmul.f32 %v1210_v35, %v1210_v35  ;;  %v1205_v38 = vadd.f32 %v1204_v36, %v1131_v33  ;;  %v1356_v33 = vrot.slane %v3392_v9, %v1355_v30 }
 0xbab   :  { %v1216_v39 = vmul.f32 %v1214_v37, %v1210_v35  ;;  %v1213_v40 = vmul.f32 %v1205_v38, %v1205_v38 }
 0xbad   :  { %v1218_v41 = vmul.f32 0.044715, %v1216_v39  ;;  %v1215_v18 = vmul.f32 %v1213_v40, %v1205_v38  ;;  %v1362_v39 = vrot.slane %v3392_v9, %v1361_v34 }
 0xbaf   :  { %v1220_v42 = vadd.f32 %v1218_v41, %v1210_v35  ;;  %v1217_v43 = vmul.f32 0.044715, %v1215_v18 }
 0xbb1   :  { %v1222_v44 = vmul.f32 0.7978846, %v1220_v42  ;;  %v1219_v45 = vadd.f32 %v1217_v43, %v1205_v38  ;;  %v3647_v42 = vld [vmem:[#allocation7 + $0x8] sm:$0xff] }
 0xbb2   :  { %v1375_v43 = vrot.slane %v3647_v42, %v79_v8 }
 0xbb3   :  { %3152 = vtanh.f32 %v1222_v44  ;;  %v1221_v46 = vmul.f32 0.7978846, %v1219_v45 }
 0xbb5   :  { %3154 = vtanh.f32 %v1221_v46 }
 0xbc0   :  { %v3153_v47 = vpop.eup %3152 }
 0xbc1   :  { %v1226_v48 = vadd.f32 1.0, %v3153_v47 }
 0xbc2   :  { %v3155_v49 = vpop.eup %3154 }
 0xbc3   :  { %v1225_v50 = vadd.f32 1.0, %v3155_v49  ;;  %v1228_v51 = vmul.f32 0.5, %v1226_v48 }
 0xbc5   :  { %v1227_v52 = vmul.f32 0.5, %v1225_v50  ;;  %v1230_v54 = vmul.f32 %v1228_v51, %v1210_v35 }
 0xbc7   :  { %v1229_v53 = vmul.f32 %v1227_v52, %v1205_v38 }
 0xbc9   :  { %2986 = vmatprep.mubr.msk.f32.mxu0 %vm1243_vm4, %v1229_v53 }
 0xbca   :  { %2987 = vmatmul.mubr.msk.f32.vlgmr.msra.gmra.mxu0 %vm1243_vm4, %v1230_v54 }
 0xc8a   :  { %v2988_v57 = vpop.f32.mrf.mxu0 }
 0xc8b   :  { %v1322_v5 = vadd.f32 %v2988_v57, %v1242_v56 }
 0xc8c   :  { %v1316_v2 = vpop.f32.mrf.mxu0 }
 0xc8d   :  { %v1317_v58 = vadd.f32 %v1316_v2, %v1242_v56  ;;  %v1326_v59 = vadd.f32 %v1322_v5, %v1123_v14  ;;  %v2709_v14 = vld [vmem:[%s3873_s2 + $0x20] sm:$0xff] }
 0xc8f   :  { %v1330_v60 = vsel %vm81_vm0, %v1326_v59, 0.0  ;;  %v1325_v61 = vadd.f32 %v1317_v58, %v3575_v20  ;;  %v2711_v20 = vld [vmem:[%s3873_s2 + $0x30] sm:$0xff] }
 0xc90   :  { %1331 = vadd.xlane.f32.xlu0 %v1330_v60  ;;  %2991 = vmatprep.subr.mxu1 %v2711_v20 }
 0xc91   :  { %v1327_v62 = vsel %vm81_vm0, %v1325_v61, 0.0  ;;  %2992 = vmatpush3.msra.mxu1 %v2711_v20 }
 0xc92   :  { %1328 = vadd.xlane.f32.xlu1 %v1327_v62  ;;  %2993 = vmatprep.subr.mxu1 %v2710_v22 }
 0xc93   :  { %2994 = vmatpush3.msra.mxu1 %v2710_v22 }
 0xc94   :  { %2995 = vmatprep.subr.mxu1 %v2709_v14 }
 0xc95   :  { %2996 = vmatpush3.msra.mxu1 %v2709_v14 }
 0xd19   :  { %v1332_v63 = vpop.xlane.xlu0 %1331 }
 0xd1a   :  { %v1334_v0 = vmul.f32 0.03125, %v1332_v63 }
 0xd1b   :  { %v1329_v1 = vpop.xlane.xlu1 %1328 }
 0xd1c   :  { %v1336_v3 = vsub.f32 %v1326_v59, %v1334_v0  ;;  %v1333_v6 = vmul.f32 0.03125, %v1329_v1 }
 0xd1e   :  { %v1335_v10 = vsub.f32 %v1325_v61, %v1333_v6  ;;  %v1338_v11 = vmul.f32 %v1336_v3, %v1336_v3 }
 0xd20   :  { %v1342_v13 = vsel %vm81_vm0, %v1338_v11, 0.0  ;;  %v1337_v15 = vmul.f32 %v1335_v10, %v1335_v10 }
 0xd21   :  { %1343 = vadd.xlane.f32.xlu0 %v1342_v13 }
 0xd22   :  { %v1339_v16 = vsel %vm81_vm0, %v1337_v15, 0.0 }
 0xd23   :  { %1340 = vadd.xlane.f32.xlu1 %v1339_v16 }
 0xdaa   :  { %v1344_v24 = vpop.xlane.xlu0 %1343 }
 0xdab   :  { %v1346_v25 = vmul.f32 0.03125, %v1344_v24 }
 0xdac   :  { %v1341_v26 = vpop.xlane.xlu1 %1340 }
 0xdad   :  { %v1348_v27 = vadd.f32 1e-12, %v1346_v25  ;;  %v1345_v28 = vmul.f32 0.03125, %v1341_v26 }
 0xdaf   :  { %3156 = vrsqrt.f32 %v1348_v27  ;;  %v1347_v29 = vadd.f32 1e-12, %v1345_v28 }
 0xdb1   :  { %3158 = vrsqrt.f32 %v1347_v29 }
 0xdbc   :  { %v3157_v31 = vpop.eup %3156 }
 0xdbd   :  { %v1352_v35 = vmul.f32 %v3157_v31, %v1336_v3 }
 0xdbe   :  { %v3159_v36 = vpop.eup %3158 }
 0xdbf   :  { %v1351_v37 = vmul.f32 %v3159_v36, %v1335_v10  ;;  %v1358_v38 = vmul.f32 %v1356_v33, %v1352_v35 }
 0xdc1   :  { %v1357_v40 = vmul.f32 %v1356_v33, %v1351_v37  ;;  %v3641_v18 = vadd.f32 %v1362_v39, %v1358_v38 }
 0xdc3   :  { %v3639_v41 = vadd.f32 %v1362_v39, %v1357_v40 }
 0xdc5   :  { %2997 = vmatprep.mubr.msk.f32.mxu1 %vm81_vm0, %v3639_v41 }
 0xdc6   :  { %2998 = vmatmul.mubr.msk.f32.vlgmr.msra.gmra.mxu1 %vm81_vm0, %v3641_v18 }
 0xe86   :  { %v2999_v44 = vpop.f32.mrf.mxu1 }
 0xe87   :  { %v3652_v45 = vadd.f32 %v2999_v44, %v1375_v43 }
 0xe88   :  { %v1448_v9 = vpop.f32.mrf.mxu1 }
 0xe89   :  { %v3654_v46 = vadd.f32 %v1448_v9, %v1375_v43  ;;  %1461 = vrot.lane.b32.xlu1 %v3652_v45, %s3298_s24 }
 0xe8b   :  { %1459 = vrot.lane.b32.xlu0 %v3654_v46, %s3298_s24  ;;  %3004 = vmatprep.mubr.msk.f32.mxu1 %vm169_vm1, %v3654_v46 }
 0xe8d   :  { %1661 = vrot.lane.b32.xlu1 %v3652_v45, %s3297_s23 }
 0xe8f   :  { %1655 = vrot.lane.b32.xlu0 %v3654_v46, %s3299_s25 }
 0xe91   :  { %1659 = vrot.lane.b32.xlu1 %v3654_v46, %s3297_s23 }
 0xe95   :  { %1657 = vrot.lane.b32.xlu1 %v3652_v45, %s3299_s25 }
 0xefb   :  { %v1462_v8 = vpop.permute.xlu1 %1461 }
 0xefc   :  { %3000 = vmatprep.subr.msk.mxu1 %vm169_vm1, %v1462_v8 }
 0xefd   :  { %3001 = vmatpush3.xpose.msk.msra.mxu1 %vm169_vm1, %v1462_v8  ;;  %v1460_v47 = vpop.permute.xlu0 %1459 }
 0xefe   :  { %3002 = vmatprep.subr.msk.mxu1 %vm169_vm1, %v1460_v47 }
 0xeff   :  { %v1662_v48 = vpop.permute.xlu1 %1661 }
 0xf01   :  { %3003 = vmatpush3.xpose.msk.msra.mxu1 %vm169_vm1, %v1460_v47  ;;  %v1656_v49 = vpop.permute.xlu0 %1655 }
 0xf02   :  { %3014 = vmatprep.subr.msk.mxu1 %vm169_vm1, %v1662_v48 }
 0xf03   :  { %v1660_v50 = vpop.permute.xlu1 %1659 }
 0xf04   :  { %3005 = vmatmul.mubr.msk.f32.vlgmr.msra.gmra.mxu1 %vm169_vm1, %v3652_v45 }
 0xf05   :  { %3015 = vmatpush3.xpose.msk.msra.mxu1 %vm169_vm1, %v1662_v48  ;;  %3018 = vmatprep.mubr.msk.f32.mxu1 %vm169_vm1, %v1656_v49 }
 0xf06   :  { %3016 = vmatprep.subr.msk.mxu1 %vm169_vm1, %v1660_v50 }
 0xf07   :  { %v1658_v51 = vpop.permute.xlu1 %1657 }
 0xf09   :  { %3017 = vmatpush3.xpose.msk.msra.mxu1 %vm169_vm1, %v1660_v50 }
 0xf0c   :  { %3019 = vmatmul.mubr.msk.f32.vlgmr.msra.gmra.mxu1 %vm169_vm1, %v1658_v51 }
 0xfc4   :  { %v3006_v52 = vpop.f32.mrf.mxu1 }
 0xfc5   :  { %v1543_v53 = vadd.f32 %v3006_v52, %v3427_v21 }
 0xfc6   :  { %v1537_v54 = vpop.f32.mrf.mxu1 }
 0xfc7   :  { %v1538_v56 = vadd.f32 %v1537_v54, %v3429_v23  ;;  %v1549_v57 = vsel %vm253_vm2, %v1543_v53, -inf }
 0xfc8   :  { %1550 = vmax.xlane.f32.xlu1 %v1549_v57 }
 0xfc9   :  { %v1546_v5 = vsel %vm253_vm2, %v1538_v56, -inf }
 0xfca   :  { %1547 = vmax.xlane.f32.xlu0 %v1546_v5 }
 0xfcc   :  { %v3020_v2 = vpop.f32.mrf.mxu1 }
 0xfcd   :  { %v1743_v60 = vadd.f32 %v3020_v2, %v3427_v21  ;;  %v3204_v2 = vld [vmem:[#allocation5 + $0x8] sm:$0xff] }
 0xfce   :  { %v1737_v58 = vpop.f32.mrf.mxu1 }
 0xfcf   :  { %v1738_v59 = vadd.f32 %v1737_v58, %v3429_v23  ;;  %v1749_v62 = vsel %vm253_vm2, %v1743_v60, -inf }
 0xfd1   :  { %v1746_v61 = vsel %vm253_vm2, %v1738_v59, -inf }
 0xfd2   :  { %1747 = vmax.xlane.f32.xlu0 %v1746_v61 }
 0xfd6   :  { %1750 = vmax.xlane.f32.xlu0 %v1749_v62 }
 0xfd9   :  { %1570 = vrot.lane.b32.xlu1 %v3652_v45, %s3300_s26 }
 0xfdd   :  { %1770 = vrot.lane.b32.xlu1 %v3652_v45, %s3301_s27 }
 0xfe1   :  { %1768 = vrot.lane.b32.xlu1 %v3654_v46, %s3301_s27 }
 0xfec   :  { %1568 = vrot.lane.b32.xlu0 %v3654_v46, %s3300_s26 }
0x1051   :  { %v1551_v23 = vpop.xlane.xlu1 %1550 }
0x1052   :  { %v1553_v21 = vsub.f32 %v1543_v53, %v1551_v23 }
0x1053   :  { %v1548_v63 = vpop.xlane.xlu0 %1547 }
0x1054   :  { %v1556_v0 = vmul.f32 1.442695, %v1553_v21  ;;  %v1552_v1 = vsub.f32 %v1538_v56, %v1548_v63 }
0x1055   :  { %v1571_v3 = vpop.permute.xlu1 %1570 }
0x1056   :  { %3160 = vpow2.f32 %v1556_v0  ;;  %v1554_v6 = vmul.f32 1.442695, %v1552_v1  ;;  %3007 = vmatprep.subr.mxu0 %v1571_v3 }
0x1057   :  { %3008 = vmatpush3.msra.mxu0 %v1571_v3 }
0x1058   :  { %3162 = vpow2.f32 %v1554_v6 }
0x1059   :  { %v1771_v14 = vpop.permute.xlu1 %1770 }
0x105b   :  { %v1748_v10 = vpop.xlane.xlu0 %1747 }
0x105c   :  { %v1752_v27 = vsub.f32 %v1738_v59, %v1748_v10 }
0x105d   :  { %v1769_v33 = vpop.permute.xlu1 %1768 }
0x105e   :  { %v1754_v28 = vmul.f32 1.442695, %v1752_v27 }
0x105f   :  { %v1751_v11 = vpop.xlane.xlu0 %1750 }
0x1060   :  { %v1753_v13 = vsub.f32 %v1743_v60, %v1751_v11  ;;  %v3205_v60 = vld [vmem:[#allocation5] sm:$0xff] }
0x1062   :  { %v1756_v15 = vmul.f32 1.442695, %v1753_v13 }
0x1063   :  { %v3161_v16 = vpop.eup %3160  ;;  %v1569_v17 = vpop.permute.xlu0 %1568 }
0x1064   :  { %3164 = vpow2.f32 %v1756_v15  ;;  %3009 = vmatprep.subr.mxu0 %v1569_v17  ;;  %v1561_v20 = vsel %vm253_vm2, %v3161_v16, 0.0 }
0x1065   :  { %v3163_v22 = vpop.eup %3162  ;;  %1562 = vadd.xlane.f32.xlu0 %v1561_v20  ;;  %3010 = vmatpush3.msra.mxu0 %v1569_v17  ;;  %3166 = vpow2.f32 %v1754_v28 }
0x1066   :  { %3021 = vmatprep.subr.mxu0 %v1771_v14  ;;  %v1558_v24 = vsel %vm253_vm2, %v3163_v22, 0.0 }
0x1067   :  { %1559 = vadd.xlane.f32.xlu1 %v1558_v24 }
0x1071   :  { %v3165_v25 = vpop.eup %3164 }
0x1072   :  { %v1761_v26 = vsel %vm253_vm2, %v3165_v25, 0.0  ;;  %v3167_v29 = vpop.eup %3166 }
0x1073   :  { %1762 = vadd.xlane.f32.xlu0 %v1761_v26  ;;  %v1758_v31 = vsel %vm253_vm2, %v3167_v29, 0.0 }
0x1078   :  { %1859 = vrot.lane.b32.xlu1 %v3654_v46, %s3302_s28 }
0x1089   :  { %1861 = vrot.lane.b32.xlu0 %v3652_v45, %s3302_s28 }
0x108d   :  { %1855 = vrot.lane.b32.xlu0 %v3654_v46, %s3303_s8 }
0x109c   :  { %1759 = vadd.xlane.f32.xlu1 %v1758_v31 }
0x10ad   :  { %1857 = vrot.lane.b32.xlu1 %v3652_v45, %s3303_s8 }
0x10ee   :  { %v1563_v35 = vpop.xlane.xlu0 %1562 }
0x10ef   :  { %3168 = vrcp.f32 %v1563_v35 }
0x10f0   :  { %v1560_v36 = vpop.xlane.xlu1 %1559 }
0x10f1   :  { %3170 = vrcp.f32 %v1560_v36 }
0x10f4   :  { %v1860_v9 = vpop.permute.xlu1 %1859 }
0x10fc   :  { %v3169_v37 = vpop.eup %3168  ;;  %v1763_v39 = vpop.xlane.xlu0 %1762 }
0x10fd   :  { %v1567_v43 = vmul.f32 %v3169_v37, %v3161_v16  ;;  %3172 = vrcp.f32 %v1763_v39 }
0x10fe   :  { %v3171_v38 = vpop.eup %3170 }
0x10ff   :  { %v1565_v40 = vmul.f32 %v3171_v38, %v3163_v22 }
0x1100   :  { %v1862_v44 = vpop.permute.xlu0 %1861 }
0x1101   :  { %3011 = vmatprep.mubr.msk.f32.mxu0 %vm253_vm2, %v1565_v40 }
0x1102   :  { %3012 = vmatmul.mubr.msk.f32.vlgmr.msra.gmra.mxu0 %vm253_vm2, %v1567_v43 }
0x1103   :  { %3022 = vmatpush3.msra.mxu0 %v1771_v14 }
0x1104   :  { %3023 = vmatprep.subr.mxu0 %v1769_v33  ;;  %v1856_v51 = vpop.permute.xlu0 %1855 }
0x1105   :  { %3024 = vmatpush3.msra.mxu0 %v1769_v33 }
0x1106   :  { %3028 = vmatprep.subr.msk.mxu0 %vm169_vm1, %v1862_v44 }
0x110a   :  { %v3173_v47 = vpop.eup %3172 }
0x110b   :  { %v1767_v50 = vmul.f32 %v3173_v47, %v3165_v25 }
0x1125   :  { %v1760_v8 = vpop.xlane.xlu1 %1759 }
0x1126   :  { %3174 = vrcp.f32 %v1760_v8 }
0x1129   :  { %v1858_v52 = vpop.permute.xlu1 %1857 }
0x1133   :  { %v3175_v48 = vpop.eup %3174 }
0x1134   :  { %v1765_v49 = vmul.f32 %v3175_v48, %v3167_v29 }
0x1136   :  { %3025 = vmatprep.mubr.msk.f32.mxu0 %vm253_vm2, %v1765_v49 }
0x1137   :  { %3026 = vmatmul.mubr.msk.f32.vlgmr.msra.gmra.mxu0 %vm253_vm2, %v1767_v50 }
0x1138   :  { %3029 = vmatpush3.xpose.msk.msra.mxu0 %vm169_vm1, %v1862_v44  ;;  %3032 = vmatprep.mubr.msk.f32.mxu0 %vm169_vm1, %v1856_v51 }
0x1139   :  { %3030 = vmatprep.subr.msk.mxu0 %vm169_vm1, %v1860_v9 }
0x113c   :  { %3031 = vmatpush3.xpose.msk.msra.mxu0 %vm169_vm1, %v1860_v9 }
0x113f   :  { %3033 = vmatmul.mubr.msk.f32.vlgmr.msra.gmra.mxu0 %vm169_vm1, %v1858_v52 }
0x11c2   :  { %v3720_v53 = vpop.f32.mrf.mxu0 }
0x11c4   :  { %v3722_v54 = vpop.f32.mrf.mxu0 }
0x11f7   :  { %v3724_v56 = vpop.f32.mrf.mxu0 }
0x11f9   :  { %v3726_v57 = vpop.f32.mrf.mxu0 }
0x11ff   :  { %v3034_v5 = vpop.f32.mrf.mxu0 }
0x1200   :  { %v1943_v58 = vadd.f32 %v3204_v2, %v3034_v5 }
0x1201   :  { %v1937_v59 = vpop.f32.mrf.mxu0 }
0x1202   :  { %v1938_v61 = vadd.f32 %v3205_v60, %v1937_v59  ;;  %v1949_v62 = vsel %vm253_vm2, %v1943_v58, -inf }
0x1203   :  { %1950 = vmax.xlane.f32.xlu1 %v1949_v62  ;;  %v2741_v62 = vld [vmem:[%s3874_s3 + $0x30] sm:$0xff] }
0x1204   :  { %v1946_v23 = vsel %vm253_vm2, %v1938_v61, -inf }
0x1205   :  { %1947 = vmax.xlane.f32.xlu0 %v1946_v23  ;;  %v2740_v23 = vld [vmem:[%s3874_s3 + $0x28] sm:$0xff] }
0x1214   :  { %1970 = vrot.lane.b32.xlu1 %v3652_v45, %s3304_s9 }
0x1218   :  { %2061 = vrot.lane.b32.xlu1 %v3652_v45, %s3305_s10 }
0x121c   :  { %2059 = vrot.lane.b32.xlu1 %v3654_v46, %s3305_s10 }
0x1220   :  { %2057 = vrot.lane.b32.xlu1 %v3652_v45, %s3306_s11 }
0x128c   :  { %v1951_v21 = vpop.xlane.xlu1 %1950 }
0x128d   :  { %v1953_v63 = vsub.f32 %v1943_v58, %v1951_v21  ;;  %v2739_v21 = vld [vmem:[%s3874_s3 + $0x20] sm:$0xff] }
0x128e   :  { %v1948_v0 = vpop.xlane.xlu0 %1947 }
0x128f   :  { %v1956_v1 = vmul.f32 1.442695, %v1953_v63  ;;  %v1952_v3 = vsub.f32 %v1938_v61, %v1948_v0 }
0x1290   :  { %v1971_v6 = vpop.permute.xlu1 %1970 }
0x1291   :  { %3176 = vpow2.f32 %v1956_v1  ;;  %v1954_v10 = vmul.f32 1.442695, %v1952_v3  ;;  %3035 = vmatprep.subr.mxu1 %v1971_v6 }
0x1292   :  { %3036 = vmatpush3.msra.mxu1 %v1971_v6 }
0x1293   :  { %3178 = vpow2.f32 %v1954_v10 }
0x1294   :  { %v2062_v14 = vpop.permute.xlu1 %2061 }
0x1298   :  { %v2060_v29 = vpop.permute.xlu1 %2059 }
0x129c   :  { %v2058_v31 = vpop.permute.xlu1 %2057 }
0x129e   :  { %v3177_v11 = vpop.eup %3176 }
0x129f   :  { %v1961_v13 = vsel %vm253_vm2, %v3177_v11, 0.0 }
0x12a0   :  { %v3179_v15 = vpop.eup %3178  ;;  %1962 = vadd.xlane.f32.xlu0 %v1961_v13 }
0x12a1   :  { %v1958_v16 = vsel %vm253_vm2, %v3179_v15, 0.0 }
0x12a4   :  { %1959 = vadd.xlane.f32.xlu0 %v1958_v16 }
0x12ba   :  { %1968 = vrot.lane.b32.xlu0 %v3654_v46, %s3304_s9 }
0x12be   :  { %2055 = vrot.lane.b32.xlu0 %v3654_v46, %s3306_s11 }
0x1329   :  { %v1963_v17 = vpop.xlane.xlu0 %1962 }
0x132a   :  { %3180 = vrcp.f32 %v1963_v17 }
0x132d   :  { %v1960_v20 = vpop.xlane.xlu0 %1959 }
0x132e   :  { %3182 = vrcp.f32 %v1960_v20 }
0x1331   :  { %v1969_v22 = vpop.permute.xlu0 %1968 }
0x1332   :  { %3037 = vmatprep.subr.mxu1 %v1969_v22 }
0x1333   :  { %3038 = vmatpush3.msra.mxu1 %v1969_v22 }
0x1334   :  { %3042 = vmatprep.subr.msk.mxu1 %vm169_vm1, %v2062_v14 }
0x1335   :  { %v2056_v28 = vpop.permute.xlu0 %2055 }
0x1337   :  { %v3181_v24 = vpop.eup %3180 }
0x1338   :  { %v1967_v27 = vmul.f32 %v3181_v24, %v3177_v11 }
0x133b   :  { %v3183_v25 = vpop.eup %3182 }
0x133c   :  { %v1965_v26 = vmul.f32 %v3183_v25, %v3179_v15 }
0x133e   :  { %3039 = vmatprep.mubr.msk.f32.mxu1 %vm253_vm2, %v1965_v26 }
0x133f   :  { %3040 = vmatmul.mubr.msk.f32.vlgmr.msra.gmra.mxu1 %vm253_vm2, %v1967_v27 }
0x1340   :  { %3043 = vmatpush3.xpose.msk.msra.mxu1 %vm169_vm1, %v2062_v14  ;;  %3046 = vmatprep.mubr.msk.f32.mxu1 %vm169_vm1, %v2056_v28 }
0x1341   :  { %3044 = vmatprep.subr.msk.mxu1 %vm169_vm1, %v2060_v29 }
0x1344   :  { %3045 = vmatpush3.xpose.msk.msra.mxu1 %vm169_vm1, %v2060_v29 }
0x1347   :  { %3047 = vmatmul.mubr.msk.f32.vlgmr.msra.gmra.mxu1 %vm169_vm1, %v2058_v31 }
0x13ff   :  { %v3041_v33 = vpop.f32.mrf.mxu1 }
0x1401   :  { %v2046_v35 = vpop.f32.mrf.mxu1 }
0x1407   :  { %v3048_v36 = vpop.f32.mrf.mxu1 }
0x1408   :  { %v2143_v37 = vadd.f32 %v3204_v2, %v3048_v36 }
0x1409   :  { %v2137_v38 = vpop.f32.mrf.mxu1 }
0x140a   :  { %v2138_v39 = vadd.f32 %v3205_v60, %v2137_v38  ;;  %v2149_v40 = vsel %vm253_vm2, %v2143_v37, -inf }
0x140b   :  { %2150 = vmax.xlane.f32.xlu1 %v2149_v40 }
0x140c   :  { %v2146_v43 = vsel %vm253_vm2, %v2138_v39, -inf }
0x140d   :  { %2147 = vmax.xlane.f32.xlu0 %v2146_v43 }
0x141c   :  { %2170 = vrot.lane.b32.xlu1 %v3652_v45, %s3307_s12 }
0x1420   :  { %2257 = vrot.lane.b32.xlu1 %v3726_v57, %s3295_s30 }
0x1424   :  { %2259 = vrot.lane.b32.xlu1 %v3724_v56, %s3295_s30 }
0x1428   :  { %2267 = vrot.lane.b32.xlu1 %v3041_v33, %s3308_s13 }
0x1494   :  { %v2151_v44 = vpop.xlane.xlu1 %2150 }
0x1495   :  { %v2153_v9 = vsub.f32 %v2143_v37, %v2151_v44  ;;  %v2747_v44 = vld [vmem:[%s3875_s4 + $0x30] sm:$0xff] }
0x1496   :  { %v2148_v8 = vpop.xlane.xlu0 %2147 }
0x1497   :  { %v2156_v47 = vmul.f32 1.442695, %v2153_v9  ;;  %v2152_v48 = vsub.f32 %v2138_v39, %v2148_v8  ;;  %v2746_v9 = vld [vmem:[%s3875_s4 + $0x28] sm:$0xff]  ;;  %v2745_v8 = vld [vmem:[%s3875_s4 + $0x20] sm:$0xff] }
0x1498   :  { %v2171_v49 = vpop.permute.xlu1 %2170 }
0x1499   :  { %3184 = vpow2.f32 %v2156_v47  ;;  %v2154_v50 = vmul.f32 1.442695, %v2152_v48  ;;  %3049 = vmatprep.subr.mxu0 %v2171_v49 }
0x149a   :  { %3050 = vmatpush3.msra.mxu0 %v2171_v49 }
0x149b   :  { %3186 = vpow2.f32 %v2154_v50 }
0x149c   :  { %v2258_v1 = vpop.permute.xlu1 %2257 }
0x149d   :  { %v2279_v11 = vsel %vm169_vm1, %v3722_v54, %v2258_v1  ;;  %v2293_v54 = vrot.slane %v3647_v42, %v1000_v19  ;;  %v2751_v1 = vld [vmem:[%s3876_s5 + $0x40] sm:$0xff] }
0x14a0   :  { %v2260_v3 = vpop.permute.xlu1 %2259 }
0x14a1   :  { %v2280_v15 = vsel %vm169_vm1, %v3720_v53, %v2260_v3  ;;  %v2423_v3 = vrot.slane %v3647_v42, %v1130_v32 }
0x14a4   :  { %v2268_v6 = vpop.permute.xlu1 %2267 }
0x14a5   :  { %v2282_v20 = vsel %vm253_vm2, %v2280_v15, %v2268_v6 }
0x14a6   :  { %v3185_v45 = vpop.eup %3184 }
0x14a7   :  { %v2161_v51 = vsel %vm253_vm2, %v3185_v45, 0.0 }
0x14a8   :  { %v3187_v52 = vpop.eup %3186  ;;  %2162 = vadd.xlane.f32.xlu0 %v2161_v51 }
0x14a9   :  { %v2158_v56 = vsel %vm253_vm2, %v3187_v52, 0.0 }
0x14ac   :  { %2159 = vadd.xlane.f32.xlu0 %v2158_v56 }
0x14c2   :  { %2168 = vrot.lane.b32.xlu0 %v3654_v46, %s3307_s12  ;;  %v2742_v46 = vld [vmem:[%s3874_s3 + $0x38] sm:$0xff] }
0x14c6   :  { %2265 = vrot.lane.b32.xlu0 %v2046_v35, %s3308_s13 }
0x1531   :  { %v2163_v57 = vpop.xlane.xlu0 %2162 }
0x1532   :  { %3188 = vrcp.f32 %v2163_v57 }
0x1535   :  { %v2160_v5 = vpop.xlane.xlu0 %2159 }
0x1536   :  { %3190 = vrcp.f32 %v2160_v5  ;;  %v2412_v5 = vrot.slane %v3647_v42, %v1120_v4  ;;  %v2757_v4 = vld [vmem:[%s3876_s5 + $0x70] sm:$0xff] }
0x1539   :  { %v2169_v2 = vpop.permute.xlu0 %2168 }
0x153a   :  { %3051 = vmatprep.subr.mxu0 %v2169_v2 }
0x153b   :  { %3052 = vmatpush3.msra.mxu0 %v2169_v2 }
0x153c   :  { %3056 = vmatprep.subr.mxu0 %v2742_v46 }
0x153d   :  { %v2266_v10 = vpop.permute.xlu0 %2265 }
0x153e   :  { %v2281_v16 = vsel %vm253_vm2, %v2279_v11, %v2266_v10 }
0x153f   :  { %v3189_v58 = vpop.eup %3188 }
0x1540   :  { %v2167_v61 = vmul.f32 %v3189_v58, %v3185_v45 }
0x1543   :  { %v3191_v59 = vpop.eup %3190 }
0x1544   :  { %v2165_v60 = vmul.f32 %v3191_v59, %v3187_v52  ;;  %v2406_v52 = vrot.slane %v3647_v42, %v1114_v12  ;;  %v2758_v12 = vld [vmem:[%s3876_s5 + $0x78] sm:$0xff] }
0x1546   :  { %3053 = vmatprep.mubr.msk.f32.mxu0 %vm253_vm2, %v2165_v60 }
0x1547   :  { %3054 = vmatmul.mubr.msk.f32.vlgmr.msra.gmra.mxu0 %vm253_vm2, %v2167_v61 }
0x1548   :  { %3057 = vmatpush3.msra.mxu0 %v2742_v46 }
0x1549   :  { %3058 = vmatprep.subr.mxu0 %v2741_v62 }
0x154a   :  { %3059 = vmatpush3.msra.mxu0 %v2741_v62  ;;  %v2756_v62 = vld [vmem:[%s3876_s5 + $0x68] sm:$0xff] }
0x154b   :  { %3060 = vmatprep.subr.mxu0 %v2740_v23 }
0x154c   :  { %3061 = vmatpush3.msra.mxu0 %v2740_v23  ;;  %v2755_v23 = vld [vmem:[%s3876_s5 + $0x60] sm:$0xff] }
0x154d   :  { %3062 = vmatprep.subr.mxu0 %v2739_v21 }
0x154e   :  { %3063 = vmatpush3.msra.mxu0 %v2739_v21  ;;  %v2754_v21 = vld [vmem:[%s3876_s5 + $0x58] sm:$0xff] }
0x154f   :  { %3078 = vmatprep.subr.mxu0 %v2758_v12 }
0x1607   :  { %v3055_v63 = vpop.f32.mrf.mxu0 }
0x1608   :  { %2275 = vrot.lane.b32.xlu1 %v3055_v63, %s3309_s20  ;;  %v2753_v63 = vld [vmem:[%s3876_s5 + $0x50] sm:$0xff] }
0x1609   :  { %v2246_v0 = vpop.f32.mrf.mxu0 }
0x160a   :  { %2273 = vrot.lane.b32.xlu0 %v2246_v0, %s3309_s20  ;;  %v2752_v0 = vld [vmem:[%s3876_s5 + $0x48] sm:$0xff]  ;;  %s3310_s5 = smov [#allocation8]  }
0x160b   :  { %s2664_s27 = sshll.u32 %s3310_s5, 4  ;;  %s2665_s27 = int_to_ptr.vmem [resolvable:$true] %s2664_s27 }
0x160c   :  { %s3266_s28 = scalar_lea.vmem %s2665_s27, 256  ;;  %p3271_p2 = scmp.lt.s32.totalorder %s2665_s27, %s2665_s27 }
0x160d   :  { %p3267_p1 = scmp.ne.s32.totalorder %s2665_s27, %s3266_s28  ;;  %p3272_p3 = scmp.lt.s32.totalorder %s3266_s28, %s3266_s28 }
0x160f   :  { %p3273_p4 = por %p3272_p3, %p3271_p2 }
0x1611   :  { %p3274_p5 = pnand %p3273_p4, %p3267_p1 }
0x167a   :  { %v2276_v13 = vpop.permute.xlu1 %2275 }
0x167b   :  { %v2284_v14 = vsel %vm991_vm3, %v2282_v20, %v2276_v13 }
0x167c   :  { %v2274_v17 = vpop.permute.xlu0 %2273 }
0x167d   :  { %v2283_v22 = vsel %vm991_vm3, %v2281_v16, %v2274_v17 }
0x167e   :  { %3064 = vmatprep.mubr.msk.f32.mxu0 %vm81_vm0, %v2283_v22 }
0x167f   :  { %3065 = vmatmul.mubr.msk.f32.vlgmr.msra.gmra.mxu0 %vm81_vm0, %v2284_v14 }
0x1680   :  { %3079 = vmatpush3.msra.mxu0 %v2758_v12 }
0x1681   :  { %3080 = vmatprep.subr.mxu0 %v2757_v4 }
0x1682   :  { %3081 = vmatpush3.msra.mxu0 %v2757_v4 }
0x1683   :  { %3082 = vmatprep.subr.mxu0 %v2756_v62 }
0x1684   :  { %3083 = vmatpush3.msra.mxu0 %v2756_v62 }
0x1685   :  { %3084 = vmatprep.subr.mxu0 %v2755_v23 }
0x1686   :  { %3085 = vmatpush3.msra.mxu0 %v2755_v23 }
0x1687   :  { %3086 = vmatprep.subr.mxu0 %v2754_v21 }
0x1688   :  { %3087 = vmatpush3.msra.mxu0 %v2754_v21 }
0x1689   :  { %3088 = vmatprep.subr.mxu0 %v2753_v63 }
0x168a   :  { %3089 = vmatpush3.msra.mxu0 %v2753_v63 }
0x168b   :  { %3090 = vmatprep.subr.mxu0 %v2752_v0 }
0x168c   :  { %3091 = vmatpush3.msra.mxu0 %v2752_v0 }
0x168d   :  { %3092 = vmatprep.subr.mxu0 %v2751_v1 }
0x168e   :  { %3093 = vmatpush3.msra.mxu0 %v2751_v1 }
0x173f   :  { %v3066_v24 = vpop.f32.mrf.mxu0 }
0x1740   :  { %v2372_v25 = vadd.f32 %v3066_v24, %v2293_v54 }
0x1741   :  { %v2366_v53 = vpop.f32.mrf.mxu0 }
0x1742   :  { %v2367_v26 = vadd.f32 %v2366_v53, %v2293_v54  ;;  %v2376_v27 = vadd.f32 %v2372_v25, %v3641_v18 }
0x1744   :  { %v2380_v28 = vsel %vm81_vm0, %v2376_v27, 0.0  ;;  %v2375_v29 = vadd.f32 %v2367_v26, %v3639_v41  ;;  %v2748_v41 = vld [vmem:[%s3875_s4 + $0x38] sm:$0xff] }
0x1745   :  { %2381 = vadd.xlane.f32.xlu1 %v2380_v28  ;;  %3067 = vmatprep.subr.mxu1 %v2748_v41 }
0x1746   :  { %v2377_v31 = vsel %vm81_vm0, %v2375_v29, 0.0  ;;  %3068 = vmatpush3.msra.mxu1 %v2748_v41 }
0x1747   :  { %2378 = vadd.xlane.f32.xlu0 %v2377_v31  ;;  %3069 = vmatprep.subr.mxu1 %v2747_v44 }
0x1748   :  { %3070 = vmatpush3.msra.mxu1 %v2747_v44 }
0x1749   :  { %3071 = vmatprep.subr.mxu1 %v2746_v9 }
0x174a   :  { %3072 = vmatpush3.msra.mxu1 %v2746_v9 }
0x174b   :  { %3073 = vmatprep.subr.mxu1 %v2745_v8 }
0x174c   :  { %3074 = vmatpush3.msra.mxu1 %v2745_v8 }
0x17ce   :  { %v2382_v33 = vpop.xlane.xlu1 %2381 }
0x17cf   :  { %v2384_v35 = vmul.f32 0.03125, %v2382_v33 }
0x17d0   :  { %v2379_v36 = vpop.xlane.xlu0 %2378 }
0x17d1   :  { %v2383_v37 = vmul.f32 0.03125, %v2379_v36  ;;  %v2386_v38 = vsub.f32 %v2376_v27, %v2384_v35  ;;  %v2535_v36 = vrot.slane %v3647_v42, %v1241_v55 }
0x17d3   :  { %v2385_v19 = vsub.f32 %v2375_v29, %v2383_v37  ;;  %v2388_v43 = vmul.f32 %v2386_v38, %v2386_v38 }
0x17d5   :  { %v2387_v39 = vmul.f32 %v2385_v19, %v2385_v19  ;;  %v2392_v18 = vsel %vm81_vm0, %v2388_v43, 0.0 }
0x17d7   :  { %v2389_v40 = vsel %vm81_vm0, %v2387_v39, 0.0 }
0x17d8   :  { %2390 = vadd.xlane.f32.xlu0 %v2389_v40 }
0x17dc   :  { %2393 = vadd.xlane.f32.xlu0 %v2392_v18 }
0x1861   :  { %v2391_v47 = vpop.xlane.xlu0 %2390 }
0x1862   :  { %v2395_v48 = vmul.f32 0.03125, %v2391_v47 }
0x1864   :  { %v2397_v49 = vadd.f32 1e-12, %v2395_v48 }
0x1865   :  { %v2394_v50 = vpop.xlane.xlu0 %2393 }
0x1866   :  { %3192 = vrsqrt.f32 %v2397_v49  ;;  %v2396_v45 = vmul.f32 0.03125, %v2394_v50 }
0x1868   :  { %v2398_v51 = vadd.f32 1e-12, %v2396_v45 }
0x186a   :  { %3194 = vrsqrt.f32 %v2398_v51 }
0x1873   :  { %v3193_v56 = vpop.eup %3192 }
0x1874   :  { %v2401_v57 = vmul.f32 %v3193_v56, %v2385_v19 }
0x1876   :  { %v2407_v2 = vmul.f32 %v2406_v52, %v2401_v57 }
0x1877   :  { %v3195_v58 = vpop.eup %3194 }
0x1878   :  { %v2402_v59 = vmul.f32 %v3195_v58, %v2386_v38  ;;  %v2413_v60 = vadd.f32 %v2412_v5, %v2407_v2 }
0x187a   :  { %v2408_v61 = vmul.f32 %v2406_v52, %v2402_v59  ;;  %3075 = vmatprep.mubr.msk.f32.mxu1 %vm81_vm0, %v2413_v60  ;;  %v2648_v59 = vrot.slane %v3647_v42, %v1355_v30 }
0x187c   :  { %v2414_v46 = vadd.f32 %v2412_v5, %v2408_v61 }
0x187e   :  { %3076 = vmatmul.mubr.msk.f32.vlgmr.msra.gmra.mxu1 %vm81_vm0, %v2414_v46 }
0x193e   :  { %v3077_v6 = vpop.f32.mrf.mxu1 }
0x193f   :  { %v2502_v10 = vadd.f32 %v3077_v6, %v2423_v3 }
0x1940   :  { %v2496_v11 = vpop.f32.mrf.mxu1 }
0x1941   :  { %v2506_v13 = vmul.f32 %v2502_v10, %v2502_v10  ;;  %v2497_v15 = vadd.f32 %v2496_v11, %v2423_v3 }
0x1943   :  { %v2508_v16 = vmul.f32 %v2506_v13, %v2502_v10  ;;  %v2505_v17 = vmul.f32 %v2497_v15, %v2497_v15 }
0x1945   :  { %v2510_v20 = vmul.f32 0.044715, %v2508_v16  ;;  %v2507_v22 = vmul.f32 %v2505_v17, %v2497_v15 }
0x1947   :  { %v2512_v14 = vadd.f32 %v2510_v20, %v2502_v10  ;;  %v2509_v54 = vmul.f32 0.044715, %v2507_v22 }
0x1949   :  { %v2514_v24 = vmul.f32 0.7978846, %v2512_v14  ;;  %v2511_v25 = vadd.f32 %v2509_v54, %v2497_v15 }
0x194b   :  { %3196 = vtanh.f32 %v2514_v24  ;;  %v2513_v53 = vmul.f32 0.7978846, %v2511_v25 }
0x194d   :  { %3198 = vtanh.f32 %v2513_v53 }
0x1958   :  { %v3197_v26 = vpop.eup %3196 }
0x1959   :  { %v2518_v27 = vadd.f32 1.0, %v3197_v26 }
0x195a   :  { %v3199_v28 = vpop.eup %3198 }
0x195b   :  { %v2517_v32 = vadd.f32 1.0, %v3199_v28  ;;  %v2520_v29 = vmul.f32 0.5, %v2518_v27 }
0x195d   :  { %v2519_v31 = vmul.f32 0.5, %v2517_v32  ;;  %v2522_v35 = vmul.f32 %v2520_v29, %v2502_v10 }
0x195f   :  { %v2521_v33 = vmul.f32 %v2519_v31, %v2497_v15 }
0x1961   :  { %3094 = vmatprep.mubr.msk.f32.mxu0 %vm1243_vm4, %v2521_v33 }
0x1962   :  { %3095 = vmatmul.mubr.msk.f32.vlgmr.msra.gmra.mxu0 %vm1243_vm4, %v2522_v35 }
0x1a22   :  { %v3096_v37 = vpop.f32.mrf.mxu0 }
0x1a23   :  { %v2614_v38 = vadd.f32 %v3096_v37, %v2535_v36 }
0x1a24   :  { %v2608_v19 = vpop.f32.mrf.mxu0 }
0x1a25   :  { %v2618_v39 = vadd.f32 %v2614_v38, %v2414_v46  ;;  %v2609_v40 = vadd.f32 %v2608_v19, %v2535_v36  ;;  %v2654_v46 = vrot.slane %v3647_v42, %v1361_v34 }
0x1a27   :  { %v2617_v43 = vadd.f32 %v2609_v40, %v2413_v60  ;;  %v2622_v18 = vsel %vm81_vm0, %v2618_v39, 0.0 }
0x1a28   :  { %2623 = vadd.xlane.f32.xlu0 %v2622_v18 }
0x1a29   :  { %v2619_v41 = vsel %vm81_vm0, %v2617_v43, 0.0 }
0x1a2a   :  { %2620 = vadd.xlane.f32.xlu1 %v2619_v41 }
0x1ab1   :  { %v2624_v44 = vpop.xlane.xlu0 %2623 }
0x1ab2   :  { %v2626_v9 = vmul.f32 0.03125, %v2624_v44 }
0x1ab3   :  { %v2621_v8 = vpop.xlane.xlu1 %2620 }
0x1ab4   :  { %v2628_v47 = vsub.f32 %v2618_v39, %v2626_v9  ;;  %v2625_v48 = vmul.f32 0.03125, %v2621_v8 }
0x1ab6   :  { %v2627_v49 = vsub.f32 %v2617_v43, %v2625_v48  ;;  %v2630_v50 = vmul.f32 %v2628_v47, %v2628_v47 }
0x1ab8   :  { %v2634_v55 = vsel %vm81_vm0, %v2630_v50, 0.0  ;;  %v2629_v45 = vmul.f32 %v2627_v49, %v2627_v49 }
0x1ab9   :  { %2635 = vadd.xlane.f32.xlu0 %v2634_v55 }
0x1aba   :  { %v2631_v51 = vsel %vm81_vm0, %v2629_v45, 0.0 }
0x1abb   :  { %2632 = vadd.xlane.f32.xlu1 %v2631_v51 }
0x1b42   :  { %v2636_v52 = vpop.xlane.xlu0 %2635 }
0x1b43   :  { %v2638_v56 = vmul.f32 0.03125, %v2636_v52 }
0x1b44   :  { %v2633_v57 = vpop.xlane.xlu1 %2632 }
0x1b45   :  { %v2640_v5 = vadd.f32 1e-12, %v2638_v56  ;;  %v2637_v2 = vmul.f32 0.03125, %v2633_v57 }
0x1b47   :  { %3200 = vrsqrt.f32 %v2640_v5  ;;  %v2639_v58 = vadd.f32 1e-12, %v2637_v2 }
0x1b49   :  { %3202 = vrsqrt.f32 %v2639_v58 }
0x1b54   :  { %v3201_v60 = vpop.eup %3200 }
0x1b55   :  { %v2644_v61 = vmul.f32 %v3201_v60, %v2628_v47 }
0x1b56   :  { %v3203_v12 = vpop.eup %3202 }
0x1b57   :  { %v2643_v4 = vmul.f32 %v3203_v12, %v2627_v49  ;;  %v2650_v62 = vmul.f32 %v2648_v59, %v2644_v61 }
0x1b59   :  { %v2649_v23 = vmul.f32 %v2648_v59, %v2643_v4  ;;  %v2656_v21 = vadd.f32 %v2654_v46, %v2650_v62 }
0x1b5b   :  { %v2655_v63 = vadd.f32 %v2654_v46, %v2649_v23  ;;  %2658 = vst.msk [vmem:[#allocation8 + $0x8] sm:$0xff] %vm81_vm0, %v2656_v21 }
0x1b5d   :  { %2657 = vst.msk [vmem:[#allocation8] sm:$0xff] %vm81_vm0, %v2655_v63 }
0x1b5e   :  { %3277 = shalt.err (!%p3274_p5)
}
0x1b5f   :  { %2670 = dma.vmem_to_hbm [thread:$0]  %s2665_s27, 256, %s3878_s7, [#allocation4], %s3294_s29, %s3294_s29, %s3295_s30  }
0x1b60   :  { %3290 = dma.done.wait [#allocation4], 256  }
0x1b61   :  { %3291 = vsyncadd [#allocation4], 4294967040 }
0x1b62   :  { %2674 = vsyncpa [#allocation3], 1 }
0x1b63   :  { %2675 = vsyncpa [#allocation6], 1 }
0x1b64   :  { %2676 = vsyncpa [#allocation4], 1 }

</bundles_post_ra>
